<compile_context>
chip_gen: v5e
topology: v5e:2x2
jax: 0.10.0
libtpu: 0.0.40
codegen_flags: <defaults>
</compile_context>

<pallas_src>
import jax
import jax.numpy as jnp
from jax import lax
from jax.experimental import pallas as pl
from jax.experimental.pallas import tpu as pltpu

EPS = 1e-5


def bn_add_conv_kernel(x_ref, skip_ref, gamma_ref, beta_ref, w_ref, o_ref):
    # x_ref, skip_ref: (C, M)   gamma/beta: (C, 1)   w_ref: (Cout, C)   o_ref: (Cout, M)
    x = x_ref[...]
    m = jnp.float32(x.shape[1])

    # BatchNorm2d in training mode: batch statistics over (N, H, W) == the lane axis here.
    mean = jnp.sum(x, axis=1, keepdims=True) / m                     # (C, 1)  XLU lane reduce
    centered = x - mean
    var = jnp.sum(centered * centered, axis=1, keepdims=True) / m    # biased variance, (C, 1)
    scale = gamma_ref[...] * lax.rsqrt(var + EPS)                    # (C, 1)  EUP rsqrt

    y = centered * scale + beta_ref[...] + skip_ref[...]             # BN affine + residual (f32)

    # 1x1 conv == matmul on the MXU: (Cout, C) @ (C, M).  bf16 feed, f32 accumulation.
    o_ref[...] = jnp.dot(
        w_ref[...].astype(jnp.bfloat16),
        y.astype(jnp.bfloat16),
        preferred_element_type=jnp.float32,
    )


def bn_add_conv(x233, x220, gamma, beta, conv_w):
    """x233, x220: (N, C, H, W) f32; conv_w: (Cout, C, 1, 1); returns (N, Cout, H, W) f32."""
    N, C, H, W = x233.shape
    Cout = conv_w.shape[0]
    M = N * H * W

    if N == 1:
        # zero-copy views in native NCHW layout
        xm = x233.reshape(C, M)
        sm = x220.reshape(C, M)
    else:
        # channels are not contiguous across batch for N>1: one transpose each is unavoidable
        xm = jnp.transpose(x233, (1, 0, 2, 3)).reshape(C, M)
        sm = jnp.transpose(x220, (1, 0, 2, 3)).reshape(C, M)

    wm = conv_w.reshape(Cout, C)                     # zero-copy
    g = gamma.reshape(C, 1).astype(jnp.float32)
    b = beta.reshape(C, 1).astype(jnp.float32)

    cost = pl.CostEstimate(
        flops=2 * Cout * C * M + 8 * C * M,
        transcendentals=C,
        bytes_accessed=(2 * C * M + 2 * C + Cout * C + Cout * M) * 4,
    )

    out = pl.pallas_call(
        bn_add_conv_kernel,
        out_shape=jax.ShapeDtypeStruct((Cout, M), jnp.float32),
        grid=(1,),
        in_specs=[
            pl.BlockSpec((C, M), lambda i: (0, 0)),
            pl.BlockSpec((C, M), lambda i: (0, 0)),
            pl.BlockSpec((C, 1), lambda i: (0, 0)),
            pl.BlockSpec((C, 1), lambda i: (0, 0)),
            pl.BlockSpec((Cout, C), lambda i: (0, 0)),
        ],
        out_specs=pl.BlockSpec((Cout, M), lambda i: (0, 0)),
        compiler_params=pltpu.CompilerParams(
            dimension_semantics=("arbitrary",),
            vmem_limit_bytes=32 * 1024 * 1024,
        ),
        cost_estimate=cost,
    )(xm, sm, g, b, wm)

    if N == 1:
        return out.reshape(1, Cout, H, W)            # zero-copy back to NCHW
    return jnp.transpose(out.reshape(Cout, N, H, W), (1, 0, 2, 3))


def reference(x233, x220, gamma, beta, conv_w):
    # pure-f32 JAX reference of the module semantics (training-mode BN + add + 1x1 conv)
    mean = jnp.mean(x233, axis=(0, 2, 3), keepdims=True)
    var = jnp.mean((x233 - mean) ** 2, axis=(0, 2, 3), keepdims=True)
    xn = (x233 - mean) * lax.rsqrt(var + EPS)
    xn = xn * gamma.reshape(1, -1, 1, 1) + beta.reshape(1, -1, 1, 1)
    y = xn + x220
    w = conv_w.reshape(conv_w.shape[0], conv_w.shape[1])  # (Cout, C)
    return jnp.einsum('nchw,oc->nohw', y, w)


if __name__ == "__main__":
    # Shapes implied by the module: N=1, C_in=112, H=W=14, C_out=672.
    N, C, H, W = 1, 112, 14, 14
    Cout = 672

    key = jax.random.PRNGKey(0)
    k1, k2, k3, k4, k5 = jax.random.split(key, 5)

    x233 = jax.random.normal(k1, (N, C, H, W), dtype=jnp.float32)
    x220 = jax.random.normal(k2, (N, C, H, W), dtype=jnp.float32)

    # Deterministic synthetic parameters (shapes from the module __init__).
    gamma = 1.0 + 0.1 * jax.random.normal(k3, (C,), dtype=jnp.float32)
    beta = 0.1 * jax.random.normal(k4, (C,), dtype=jnp.float32)
    conv_w = jax.random.normal(k5, (Cout, C, 1, 1), dtype=jnp.float32) * (1.0 / jnp.sqrt(C))

    fused = jax.jit(bn_add_conv)
    out = jax.block_until_ready(fused(x233, x220, gamma, beta, conv_w))

    ref = reference(x233, x220, gamma, beta, conv_w)
    assert out.shape == (N, Cout, H, W), out.shape
    # Tolerance sized for the bf16 MXU feed (~2^-8 relative per operand over K=112 contraction);
    # the BN / add path is exact f32.  Real bugs produce O(1) errors, far above this.
    assert jnp.allclose(out, ref, atol=5e-2, rtol=5e-2), float(jnp.max(jnp.abs(out - ref)))

    print("KERNEL_OK")
</pallas_src>

<mosaic_0001>
module attributes {stable_mosaic.version = 11 : i64} {
  func.func @bn_add_conv_kernel(%arg0: i32, %arg1: memref<112x196xf32, #tpu.memory_space<vmem>>, %arg2: memref<112x196xf32, #tpu.memory_space<vmem>>, %arg3: memref<112x1xf32, #tpu.memory_space<vmem>>, %arg4: memref<112x1xf32, #tpu.memory_space<vmem>>, %arg5: memref<672x112xf32, #tpu.memory_space<vmem>>, %arg6: memref<672x196xf32, #tpu.memory_space<vmem>>) attributes {dimension_semantics = [#tpu.dimension_semantics<arbitrary>], iteration_bounds = array<i64: 1>, scalar_prefetch = 0 : i64, scratch_operands = 0 : i64, tpu.core_type = #tpu.core_type<tc>, window_params = [{pipeline_mode = #tpu.pipeline_mode<synchronous>, transform_indices = @transform_0, window_bounds = array<i64: 112, 196>}, {pipeline_mode = #tpu.pipeline_mode<synchronous>, transform_indices = @transform_1, window_bounds = array<i64: 112, 196>}, {pipeline_mode = #tpu.pipeline_mode<synchronous>, transform_indices = @transform_2, window_bounds = array<i64: 112, 1>}, {pipeline_mode = #tpu.pipeline_mode<synchronous>, transform_indices = @transform_3, window_bounds = array<i64: 112, 1>}, {pipeline_mode = #tpu.pipeline_mode<synchronous>, transform_indices = @transform_4, window_bounds = array<i64: 672, 112>}, {pipeline_mode = #tpu.pipeline_mode<synchronous>, transform_indices = @transform_5, window_bounds = array<i64: 672, 196>}]} {
    %c0 = arith.constant 0 : index
    %c0_0 = arith.constant 0 : index
    %0 = vector.load %arg1[%c0, %c0_0] : memref<112x196xf32, #tpu.memory_space<vmem>>, vector<112x196xf32>
    %cst = arith.constant dense<0.000000e+00> : vector<112xf32>
    %1 = vector.multi_reduction <add>, %0, %cst [1] : vector<112x196xf32> to vector<112xf32>
    %2 = vector.shape_cast %1 : vector<112xf32> to vector<112x1xf32>
    %cst_1 = arith.constant 1.960000e+02 : f32
    %3 = vector.broadcast %cst_1 : f32 to vector<112x1xf32>
    %4 = arith.divf %2, %3 : vector<112x1xf32>
    %5 = vector.broadcast %4 : vector<112x1xf32> to vector<112x196xf32>
    %6 = arith.subf %0, %5 : vector<112x196xf32>
    %7 = arith.mulf %6, %6 : vector<112x196xf32>
    %cst_2 = arith.constant dense<0.000000e+00> : vector<112xf32>
    %8 = vector.multi_reduction <add>, %7, %cst_2 [1] : vector<112x196xf32> to vector<112xf32>
    %9 = vector.shape_cast %8 : vector<112xf32> to vector<112x1xf32>
    %cst_3 = arith.constant 1.960000e+02 : f32
    %10 = vector.broadcast %cst_3 : f32 to vector<112x1xf32>
    %11 = arith.divf %9, %10 : vector<112x1xf32>
    %c0_4 = arith.constant 0 : index
    %c0_5 = arith.constant 0 : index
    %12 = vector.load %arg3[%c0_4, %c0_5] : memref<112x1xf32, #tpu.memory_space<vmem>>, vector<112x1xf32>
    %cst_6 = arith.constant 9.99999974E-6 : f32
    %13 = vector.broadcast %cst_6 : f32 to vector<112x1xf32>
    %14 = arith.addf %11, %13 : vector<112x1xf32>
    %15 = math.rsqrt %14 : vector<112x1xf32>
    %16 = arith.mulf %12, %15 : vector<112x1xf32>
    %17 = vector.broadcast %16 : vector<112x1xf32> to vector<112x196xf32>
    %18 = arith.mulf %6, %17 : vector<112x196xf32>
    %c0_7 = arith.constant 0 : index
    %c0_8 = arith.constant 0 : index
    %19 = vector.load %arg4[%c0_7, %c0_8] : memref<112x1xf32, #tpu.memory_space<vmem>>, vector<112x1xf32>
    %20 = vector.broadcast %19 : vector<112x1xf32> to vector<112x196xf32>
    %21 = arith.addf %18, %20 : vector<112x196xf32>
    %c0_9 = arith.constant 0 : index
    %c0_10 = arith.constant 0 : index
    %22 = vector.load %arg2[%c0_9, %c0_10] : memref<112x196xf32, #tpu.memory_space<vmem>>, vector<112x196xf32>
    %23 = arith.addf %21, %22 : vector<112x196xf32>
    %c0_11 = arith.constant 0 : index
    %c0_12 = arith.constant 0 : index
    %24 = vector.load %arg5[%c0_11, %c0_12] : memref<672x112xf32, #tpu.memory_space<vmem>>, vector<672x112xf32>
    %25 = arith.truncf %24 : vector<672x112xf32> to vector<672x112xbf16>
    %26 = arith.truncf %23 : vector<112x196xf32> to vector<112x196xbf16>
    %cst_13 = arith.constant dense<0.000000e+00> : vector<672x196xf32>
    %27 = tpu.matmul %25, %26, %cst_13 {dimension_numbers = #tpu.dot_dimension_numbers<[1], [0], [0], [1], [0, 0, 1, 1], [], []>} : vector<672x112xbf16>, vector<112x196xbf16>, vector<672x196xf32> -> vector<672x196xf32>
    %c0_14 = arith.constant 0 : index
    %c0_15 = arith.constant 0 : index
    %28 = vector.load %arg6[%c0_14, %c0_15] : memref<672x196xf32, #tpu.memory_space<vmem>>, vector<672x196xf32>
    tpu.vector_store %arg6[%c0_14, %c0_15], %27 {strides = array<i32>} : memref<672x196xf32, #tpu.memory_space<vmem>>, vector<672x196xf32>,
    return
  }
  func.func @transform_0(%arg0: i32) -> (i32, i32) {
    %c0_i32 = arith.constant 0 : i32
    %c0_i32_0 = arith.constant 0 : i32
    %c0_i32_1 = arith.constant 0 : i32
    return %c0_i32, %c0_i32_0 : i32, i32
  }
  func.func @transform_1(%arg0: i32) -> (i32, i32) {
    %c0_i32 = arith.constant 0 : i32
    %c0_i32_0 = arith.constant 0 : i32
    %c0_i32_1 = arith.constant 0 : i32
    return %c0_i32, %c0_i32_0 : i32, i32
  }
  func.func @transform_2(%arg0: i32) -> (i32, i32) {
    %c0_i32 = arith.constant 0 : i32
    %c0_i32_0 = arith.constant 0 : i32
    %c0_i32_1 = arith.constant 0 : i32
    return %c0_i32, %c0_i32_0 : i32, i32
  }
  func.func @transform_3(%arg0: i32) -> (i32, i32) {
    %c0_i32 = arith.constant 0 : i32
    %c0_i32_0 = arith.constant 0 : i32
    %c0_i32_1 = arith.constant 0 : i32
    return %c0_i32, %c0_i32_0 : i32, i32
  }
  func.func @transform_4(%arg0: i32) -> (i32, i32) {
    %c0_i32 = arith.constant 0 : i32
    %c0_i32_0 = arith.constant 0 : i32
    %c0_i32_1 = arith.constant 0 : i32
    return %c0_i32, %c0_i32_0 : i32, i32
  }
  func.func @transform_5(%arg0: i32) -> (i32, i32) {
    %c0_i32 = arith.constant 0 : i32
    %c0_i32_0 = arith.constant 0 : i32
    %c0_i32_1 = arith.constant 0 : i32
    return %c0_i32, %c0_i32_0 : i32, i32
  }
}

</mosaic_0001>

<bundles_post_ra>
// kernel: bn_add_conv.1
= control target key start
LH: loop header
LB: loop body
LE: loop exit
PB: predicated region body
PF: predicated region fallthrough
CT: control target
= control target key end

     0   :  { %vm49_vm0 = vcmask 556032   ;;  %v1711_v21 = vmov 0   ;;  %s3520_s0 = inlined_call_operand.vmem [shape: f32[112,196], index: 0, kind: input, shape index: {}]   ;;  %s3521_s3 = inlined_call_operand.vmem [shape: f32[112,1], index: 3, kind: input, shape index: {}]   ;;  %s3522_s2 = inlined_call_operand.vmem [shape: f32[112,1], index: 2, kind: input, shape index: {}]   ;;  %s3523_s1 = inlined_call_operand.vmem [shape: f32[112,196], index: 1, kind: input, shape index: {}]   ;;  %s3524_s4 = inlined_call_operand.vmem [shape: f32[672,112], index: 4, kind: input, shape index: {}]   ;;  %s3525_s5 = inlined_call_operand.vmem [shape: f32[672,196], index: 5, kind: output, shape index: {}]  }
   0x1   :  { %v1746_v0 = vld [vmem:[%s3520_s0 + $0xc0] sm:$0xff]  ;;  %v1751_v1 = vld [vmem:[%s3520_s0 + $0xc8] sm:$0xff]  ;;  %v1783_v10 = vld [vmem:[%s3520_s0 + $0xd8] sm:$0xff]  ;;  %1679 = vset.pattern.permute.xlu2 %v1711_v21  ;;  %1680 = vset.pattern.permute.xlu1 %v1711_v21 }
   0x2   :  { %v1756_v2 = vld [vmem:[%s3520_s0 + $0xa0] sm:$0xff]  ;;  %v98_v3 = vsel %vm49_vm0, %v1751_v1, 0.0  ;;  %v1763_v4 = vld [vmem:[%s3520_s0 + $0xa8] sm:$0xff]  ;;  %v1790_v13 = vld [vmem:[%s3520_s0 + $0xb8] sm:$0xff]  ;;  %v102_v16 = vsel %vm49_vm0, %v1783_v10, 0.0  ;;  %1678 = vset.pattern.permute.xlu0 %v1711_v21 }
   0x3   :  { %v1768_v5 = vld [vmem:[%s3520_s0 + $0x80] sm:$0xff]  ;;  %v1773_v6 = vld [vmem:[%s3520_s0 + $0x88] sm:$0xff]  ;;  %v99_v7 = vadd.f32 %v98_v3, %v1746_v0  ;;  %v90_v8 = vsel %vm49_vm0, %v1763_v4, 0.0  ;;  %v1795_v14 = vld [vmem:[%s3520_s0 + $0x98] sm:$0xff]  ;;  %v94_v18 = vsel %vm49_vm0, %v1790_v13, 0.0 }
   0x4   :  { %v82_v9 = vsel %vm49_vm0, %v1773_v6, 0.0  ;;  %v91_v11 = vadd.f32 %v90_v8, %v1756_v2  ;;  %v1800_v15 = vld [vmem:[%s3520_s0 + $0xd0] sm:$0xff]  ;;  %v86_v20 = vsel %vm49_vm0, %v1795_v14, 0.0  ;;  %v1824_v25 = vld [vmem:[%s3520_s0 + $0x68] sm:$0xff]  ;;  %v1829_v26 = vld [vmem:[%s3520_s0 + $0x78] sm:$0xff] }
   0x5   :  { %v83_v12 = vadd.f32 %v82_v9, %v1768_v5  ;;  %100 = vadd.xlane.f32.xlu0 %v99_v7  ;;  %v1807_v17 = vld [vmem:[%s3520_s0 + $0xb0] sm:$0xff]  ;;  %v103_v22 = vadd.f32 %v102_v16, %v1800_v15  ;;  %v1834_v27 = vld [vmem:[%s3520_s0 + $0x48] sm:$0xff]  ;;  %v1839_v28 = vld [vmem:[%s3520_s0 + $0x60] sm:$0xff]  ;;  %v74_v29 = vsel %vm49_vm0, %v1824_v25, 0.0  ;;  %v78_v31 = vsel %vm49_vm0, %v1829_v26, 0.0 }
   0x6   :  { %92 = vadd.xlane.f32.xlu1 %v91_v11  ;;  %v1814_v19 = vld [vmem:[%s3520_s0 + $0x90] sm:$0xff]  ;;  %v95_v23 = vadd.f32 %v94_v18, %v1807_v17  ;;  %v1853_v32 = vld [vmem:[%s3520_s0 + $0x40] sm:$0xff]  ;;  %v66_v33 = vsel %vm49_vm0, %v1834_v27, 0.0  ;;  %v75_v34 = vadd.f32 %v74_v29, %v1839_v28  ;;  %v1863_v37 = vld [vmem:[%s3520_s0 + $0x58] sm:$0xff] }
   0x7   :  { %84 = vadd.xlane.f32.xlu2 %v83_v12  ;;  %v87_v24 = vadd.f32 %v86_v20, %v1814_v19  ;;  %v1846_v30 = vld [vmem:[%s3520_s0 + $0x70] sm:$0xff]  ;;  %v67_v36 = vadd.f32 %v66_v33, %v1853_v32  ;;  %v1868_v38 = vld [vmem:[%s3520_s0 + $0x38] sm:$0xff]  ;;  %v1873_v39 = vld [vmem:[%s3520_s0 + $0x28] sm:$0xff]  ;;  %v70_v41 = vsel %vm49_vm0, %v1863_v37, 0.0  ;;  %v1712_v12 = vmov 196.0  }
   0x8   :  { %v79_v35 = vadd.f32 %v78_v31, %v1846_v30  ;;  %v1878_v40 = vld [vmem:[%s3520_s0 + $0x50] sm:$0xff]  ;;  %v62_v43 = vsel %vm49_vm0, %v1868_v38, 0.0  ;;  %v1892_v44 = vld [vmem:[%s3520_s0 + $0x20] sm:$0xff]  ;;  %v58_v45 = vsel %vm49_vm0, %v1873_v39, 0.0  ;;  %v1902_v49 = vld [vmem:[%s3520_s0 + $0x8] sm:$0xff]  ;;  %1681 = vrcp.f32 %v1712_v12 }
   0x9   :  { %v1885_v42 = vld [vmem:[%s3520_s0 + $0x30] sm:$0xff]  ;;  %v71_v46 = vadd.f32 %v70_v41, %v1878_v40  ;;  %v59_v48 = vadd.f32 %v58_v45, %v1892_v44  ;;  %v1907_v50 = vld [vmem:[%s3520_s0 + $0x18] sm:$0xff]  ;;  %v1912_v51 = vld [vmem:[%s3520_s0] sm:$0xff]  ;;  %v50_v52 = vsel %vm49_vm0, %v1902_v49, 0.0 }
   0xa   :  { %v63_v47 = vadd.f32 %v62_v43, %v1885_v42  ;;  %v1919_v53 = vld [vmem:[%s3520_s0 + $0x10] sm:$0xff]  ;;  %v54_v54 = vsel %vm49_vm0, %v1907_v50, 0.0  ;;  %v51_v55 = vadd.f32 %v50_v52, %v1912_v51  ;;  %v546_v57 = vld [vmem:[%s3521_s3 + $0x68] sm:$0xff]  ;;  %v545_v58 = vld [vmem:[%s3521_s3 + $0x60] sm:$0xff] }
   0xb   :  { %v55_v56 = vadd.f32 %v54_v54, %v1919_v53  ;;  %v544_v59 = vld [vmem:[%s3521_s3 + $0x58] sm:$0xff]  ;;  %v543_v60 = vld [vmem:[%s3521_s3 + $0x50] sm:$0xff]  ;;  %v541_v62 = vld [vmem:[%s3521_s3 + $0x40] sm:$0xff] }
   0xc   :  { %v540_v61 = vld [vmem:[%s3521_s3 + $0x38] sm:$0xff]  ;;  %v542_v63 = vld [vmem:[%s3521_s3 + $0x48] sm:$0xff]  ;;  %v537_v3 = vld [vmem:[%s3521_s3 + $0x20] sm:$0xff] }
   0xd   :  { %104 = vadd.xlane.f32.xlu0 %v103_v22  ;;  %v538_v7 = vld [vmem:[%s3521_s3 + $0x28] sm:$0xff]  ;;  %v539_v8 = vld [vmem:[%s3521_s3 + $0x30] sm:$0xff]  ;;  %v536_v11 = vld [vmem:[%s3521_s3 + $0x18] sm:$0xff] }
   0xe   :  { %96 = vadd.xlane.f32.xlu1 %v95_v23  ;;  %v535_v9 = vld [vmem:[%s3521_s3 + $0x10] sm:$0xff]  ;;  %v1682_v16 = vpop.eup %1681 }
   0xf   :  { %88 = vadd.xlane.f32.xlu2 %v87_v24  ;;  %v107_v18 = vmul.f32 196.0, %v1682_v16  ;;  %vm111_vm1 = vweird.f32 %v1682_v16 }
  0x11   :  { %v108_v20 = vsub.f32 1.0, %v107_v18 }
  0x13   :  { %v109_v21 = vmul.f32 %v1682_v16, %v108_v20 }
  0x15   :  { %76 = vadd.xlane.f32.xlu0 %v75_v34  ;;  %v110_v22 = vadd.f32 %v1682_v16, %v109_v21 }
  0x16   :  { %80 = vadd.xlane.f32.xlu1 %v79_v35 }
  0x17   :  { %68 = vadd.xlane.f32.xlu2 %v67_v36  ;;  %v1961_v23 = vsel %vm111_vm1, %v1682_v16, %v110_v22 }
  0x1d   :  { %72 = vadd.xlane.f32.xlu0 %v71_v46 }
  0x1e   :  { %60 = vadd.xlane.f32.xlu1 %v59_v48 }
  0x1f   :  { %64 = vadd.xlane.f32.xlu2 %v63_v47 }
  0x25   :  { %52 = vadd.xlane.f32.xlu0 %v51_v55 }
  0x26   :  { %56 = vadd.xlane.f32.xlu1 %v55_v56 }
  0x37   :  { %614 = vperm.xlu2 %1679, %v546_v57  }
  0x39   :  { %609 = vperm.xlu0 %1678, %v545_v58  }
  0x3f   :  { %604 = vperm.xlu2 %1679, %v544_v59   ;;  %599 = vperm.xlu1 %1680, %v543_v60  }
  0x41   :  { %584 = vperm.xlu0 %1678, %v540_v61  }
  0x47   :  { %589 = vperm.xlu2 %1679, %v541_v62   ;;  %594 = vperm.xlu1 %1680, %v542_v63  }
  0x49   :  { %569 = vperm.xlu0 %1678, %v537_v3  }
  0x4f   :  { %574 = vperm.xlu2 %1679, %v538_v7   ;;  %579 = vperm.xlu1 %1680, %v539_v8  }
  0x57   :  { %559 = vperm.xlu2 %1679, %v535_v9   ;;  %564 = vperm.xlu1 %1680, %v536_v11  }
  0x78   :  { %v101_v24 = vpop.xlane.xlu0 %100 }
  0x79   :  { %v125_v29 = vmul.f32 %v1961_v23, %v101_v24  ;;  %v93_v31 = vpop.xlane.xlu1 %92 }
  0x7a   :  { %v85_v33 = vpop.xlane.xlu2 %84  ;;  %v123_v34 = vmul.f32 %v1961_v23, %v93_v31 }
  0x7b   :  { %v1966_v35 = vsub.f32 %v1746_v0, %v125_v29  ;;  %v1969_v36 = vsub.f32 %v1751_v1, %v125_v29 }
  0x7c   :  { %v1972_v41 = vsub.f32 %v1756_v2, %v123_v34  ;;  %v1975_v43 = vsub.f32 %v1763_v4, %v123_v34  ;;  %v121_v4 = vmul.f32 %v1961_v23, %v85_v33 }
  0x7d   :  { %v179_v45 = vmul.f32 %v1966_v35, %v1966_v35  ;;  %v180_v46 = vmul.f32 %v1969_v36, %v1969_v36 }
  0x7e   :  { %v175_v47 = vmul.f32 %v1972_v41, %v1972_v41  ;;  %v176_v0 = vmul.f32 %v1975_v43, %v1975_v43  ;;  %v2010_v8 = vsub.f32 %v1773_v6, %v121_v4  ;;  %v2026_v9 = vsub.f32 %v1768_v5, %v121_v4 }
  0x7f   :  { %v231_v1 = vsel %vm49_vm0, %v180_v46, 0.0 }
  0x80   :  { %v105_v48 = vpop.xlane.xlu0 %104  ;;  %v232_v2 = vadd.f32 %v231_v1, %v179_v45  ;;  %v223_v52 = vsel %vm49_vm0, %v176_v0, 0.0  ;;  %v172_v31 = vmul.f32 %v2010_v8, %v2010_v8  ;;  %v171_v0 = vmul.f32 %v2026_v9, %v2026_v9 }
  0x81   :  { %v126_v54 = vmul.f32 %v1961_v23, %v105_v48  ;;  %v97_v55 = vpop.xlane.xlu1 %96  ;;  %v224_v57 = vadd.f32 %v223_v52, %v175_v47 }
  0x82   :  { %v89_v56 = vpop.xlane.xlu2 %88  ;;  %v124_v58 = vmul.f32 %v1961_v23, %v97_v55  ;;  %233 = vadd.xlane.f32.xlu2 %v232_v2  ;;  %v215_v48 = vsel %vm49_vm0, %v172_v31, 0.0 }
  0x83   :  { %v122_v59 = vmul.f32 %v1961_v23, %v89_v56  ;;  %v1992_v60 = vsub.f32 %v1800_v15, %v126_v54  ;;  %v1995_v61 = vsub.f32 %v1783_v10, %v126_v54  ;;  %225 = vadd.xlane.f32.xlu1 %v224_v57  ;;  %v216_v55 = vadd.f32 %v215_v48, %v171_v0 }
  0x84   :  { %v1998_v62 = vsub.f32 %v1807_v17, %v124_v58  ;;  %v2001_v63 = vsub.f32 %v1790_v13, %v124_v58 }
  0x85   :  { %v2004_v3 = vsub.f32 %v1814_v19, %v122_v59  ;;  %v2007_v7 = vsub.f32 %v1795_v14, %v122_v59  ;;  %v181_v10 = vmul.f32 %v1992_v60, %v1992_v60  ;;  %v182_v15 = vmul.f32 %v1995_v61, %v1995_v61 }
  0x86   :  { %v177_v17 = vmul.f32 %v1998_v62, %v1998_v62  ;;  %v178_v13 = vmul.f32 %v2001_v63, %v2001_v63 }
  0x87   :  { %v173_v19 = vmul.f32 %v2004_v3, %v2004_v3  ;;  %v174_v14 = vmul.f32 %v2007_v7, %v2007_v7  ;;  %v235_v6 = vsel %vm49_vm0, %v182_v15, 0.0 }
  0x88   :  { %v77_v11 = vpop.xlane.xlu0 %76  ;;  %v227_v12 = vsel %vm49_vm0, %v178_v13, 0.0  ;;  %v236_v18 = vadd.f32 %v235_v6, %v181_v10 }
  0x89   :  { %v219_v16 = vsel %vm49_vm0, %v174_v14, 0.0  ;;  %v119_v20 = vmul.f32 %v1961_v23, %v77_v11  ;;  %v81_v22 = vpop.xlane.xlu1 %80  ;;  %v228_v24 = vadd.f32 %v227_v12, %v177_v17 }
  0x8a   :  { %v69_v21 = vpop.xlane.xlu2 %68  ;;  %v220_v29 = vadd.f32 %v219_v16, %v173_v19  ;;  %v120_v5 = vmul.f32 %v1961_v23, %v81_v22  ;;  %237 = vadd.xlane.f32.xlu0 %v236_v18 }
  0x8b   :  { %v117_v33 = vmul.f32 %v1961_v23, %v69_v21  ;;  %v2036_v34 = vsub.f32 %v1839_v28, %v119_v20  ;;  %v2039_v45 = vsub.f32 %v1824_v25, %v119_v20  ;;  %229 = vadd.xlane.f32.xlu2 %v228_v24 }
  0x8c   :  { %221 = vadd.xlane.f32.xlu1 %v220_v29  ;;  %v2050_v1 = vsub.f32 %v1829_v26, %v120_v5  ;;  %v2063_v52 = vsub.f32 %v1846_v30, %v120_v5 }
  0x8d   :  { %v2042_v46 = vsub.f32 %v1853_v32, %v117_v33  ;;  %v2045_v47 = vsub.f32 %v1834_v27, %v117_v33  ;;  %v167_v28 = vmul.f32 %v2036_v34, %v2036_v34  ;;  %v168_v25 = vmul.f32 %v2039_v45, %v2039_v45 }
  0x8e   :  { %v170_v10 = vmul.f32 %v2050_v1, %v2050_v1  ;;  %v169_v6 = vmul.f32 %v2063_v52, %v2063_v52 }
  0x8f   :  { %3543 = vst [vmem:[#allocation2_spill] sm:$0xff] %v2042_v46  ;;  %v163_v32 = vmul.f32 %v2042_v46, %v2042_v46  ;;  %v164_v27 = vmul.f32 %v2045_v47, %v2045_v47  ;;  %v207_v2 = vsel %vm49_vm0, %v168_v25, 0.0 }
  0x90   :  { %3544 = vst [vmem:[#allocation3_spill] sm:$0xff] %v2045_v47  ;;  %v73_v26 = vpop.xlane.xlu0 %72  ;;  %v208_v4 = vadd.f32 %v207_v2, %v167_v28  ;;  %v211_v12 = vsel %vm49_vm0, %v170_v10, 0.0 }
  0x91   :  { %v199_v54 = vsel %vm49_vm0, %v164_v27, 0.0  ;;  %v118_v56 = vmul.f32 %v1961_v23, %v73_v26  ;;  %v61_v58 = vpop.xlane.xlu1 %60  ;;  %v212_v22 = vadd.f32 %v211_v12, %v169_v6 }
  0x92   :  { %v65_v57 = vpop.xlane.xlu2 %64  ;;  %v200_v59 = vadd.f32 %v199_v54, %v163_v32  ;;  %v115_v17 = vmul.f32 %v1961_v23, %v61_v58  ;;  %217 = vadd.xlane.f32.xlu0 %v216_v55 }
  0x93   :  { %v116_v15 = vmul.f32 %v1961_v23, %v65_v57  ;;  %v2072_v30 = vsub.f32 %v1878_v40, %v118_v56  ;;  %v2075_v13 = vsub.f32 %v1863_v37, %v118_v56  ;;  %209 = vadd.xlane.f32.xlu2 %v208_v4 }
  0x94   :  { %201 = vadd.xlane.f32.xlu1 %v200_v59  ;;  %v2086_v11 = vsub.f32 %v1873_v39, %v115_v17  ;;  %v2099_v18 = vsub.f32 %v1892_v44, %v115_v17 }
  0x95   :  { %3545 = vst [vmem:[#allocation4_spill] sm:$0xff] %v2072_v30  ;;  %v2078_v19 = vsub.f32 %v1885_v42, %v116_v15  ;;  %v2081_v14 = vsub.f32 %v1868_v38, %v116_v15  ;;  %v165_v40 = vmul.f32 %v2072_v30, %v2072_v30  ;;  %v166_v37 = vmul.f32 %v2075_v13, %v2075_v13 }
  0x96   :  { %3546 = vst [vmem:[#allocation5_spill] sm:$0xff] %v2075_v13  ;;  %v160_v33 = vmul.f32 %v2086_v11, %v2086_v11  ;;  %v159_v28 = vmul.f32 %v2099_v18, %v2099_v18 }
  0x97   :  { %3547 = vst [vmem:[#allocation6_spill] sm:$0xff] %v2078_v19  ;;  %v161_v42 = vmul.f32 %v2078_v19, %v2078_v19  ;;  %v162_v38 = vmul.f32 %v2081_v14, %v2081_v14  ;;  %v203_v16 = vsel %vm49_vm0, %v166_v37, 0.0 }
  0x98   :  { %3548 = vst [vmem:[#allocation7_spill] sm:$0xff] %v2081_v14  ;;  %v53_v39 = vpop.xlane.xlu0 %52  ;;  %v204_v20 = vadd.f32 %v203_v16, %v165_v40  ;;  %v191_v48 = vsel %vm49_vm0, %v160_v33, 0.0 }
  0x99   :  { %3549 = vst [vmem:[#allocation8_spill] sm:$0xff] %v2086_v11  ;;  %v195_v21 = vsel %vm49_vm0, %v162_v38, 0.0  ;;  %v113_v24 = vmul.f32 %v1961_v23, %v53_v39  ;;  %v57_v29 = vpop.xlane.xlu1 %56  ;;  %v192_v2 = vadd.f32 %v191_v48, %v159_v28 }
  0x9a   :  { %3550 = vst [vmem:[#allocation9_spill] sm:$0xff] %v2099_v18  ;;  %v196_v31 = vadd.f32 %v195_v21, %v161_v42  ;;  %v114_v5 = vmul.f32 %v1961_v23, %v57_v29  ;;  %213 = vadd.xlane.f32.xlu0 %v212_v22  ;;  %v2131_v56 = vpop.permute.xlu2 %614 }
  0x9b   :  { %v2107_v0 = vsub.f32 %v1912_v51, %v113_v24  ;;  %v2110_v44 = vsub.f32 %v1902_v49, %v113_v24  ;;  %205 = vadd.xlane.f32.xlu2 %v204_v20 }
  0x9c   :  { %197 = vadd.xlane.f32.xlu1 %v196_v31  ;;  %v2115_v25 = vsub.f32 %v1907_v50, %v114_v5  ;;  %v2124_v49 = vsub.f32 %v1919_v53, %v114_v5 }
  0x9d   :  { %3551 = vst [vmem:[#allocation10_spill] sm:$0xff] %v2107_v0  ;;  %v155_v32 = vmul.f32 %v2107_v0, %v2107_v0  ;;  %v156_v51 = vmul.f32 %v2110_v44, %v2110_v44 }
  0x9e   :  { %3552 = vst [vmem:[#allocation11_spill] sm:$0xff] %v2110_v44  ;;  %v158_v4 = vmul.f32 %v2115_v25, %v2115_v25  ;;  %v157_v50 = vmul.f32 %v2124_v49, %v2124_v49 }
  0x9f   :  { %3553 = vst [vmem:[#allocation12_spill] sm:$0xff] %v2115_v25  ;;  %v183_v27 = vsel %vm49_vm0, %v156_v51, 0.0 }
  0xa0   :  { %3554 = vst [vmem:[#allocation13_spill] sm:$0xff] %v2124_v49  ;;  %v184_v26 = vadd.f32 %v183_v27, %v155_v32  ;;  %v187_v54 = vsel %vm49_vm0, %v158_v4, 0.0 }
  0xa1   :  { %v188_v55 = vadd.f32 %v187_v54, %v157_v50 }
  0xa2   :  { %193 = vadd.xlane.f32.xlu0 %v192_v2  ;;  %v2133_v57 = vpop.permute.xlu2 %604 }
  0xa3   :  { %185 = vadd.xlane.f32.xlu2 %v184_v26 }
  0xaa   :  { %189 = vadd.xlane.f32.xlu0 %v188_v55  ;;  %v2137_v58 = vpop.permute.xlu2 %589 }
  0xab   :  { %v2141_v10 = vpop.permute.xlu0 %609 }
  0xb1   :  { %v2135_v53 = vpop.permute.xlu1 %599 }
  0xb2   :  { %v2143_v15 = vpop.permute.xlu2 %574 }
  0xb3   :  { %3555 = vst [vmem:[#allocation14_spill] sm:$0xff] %v2143_v15  ;;  %v2147_v6 = vpop.permute.xlu0 %584  ;;  %v263_v15 = vld [vmem:[%s3522_s2 + $0x50] sm:$0xff] }
  0xb4   :  { %3556 = vst [vmem:[#allocation15_spill] sm:$0xff] %v2147_v6 }
  0xb9   :  { %v2139_v59 = vpop.permute.xlu1 %594 }
  0xba   :  { %v2149_v40 = vpop.permute.xlu2 %559 }
  0xbb   :  { %3557 = vst [vmem:[#allocation16_spill] sm:$0xff] %v2149_v40  ;;  %v2153_v12 = vpop.permute.xlu0 %569 }
  0xbc   :  { %3559 = vst [vmem:[#allocation18_spill] sm:$0xff] %v2153_v12 }
  0xc1   :  { %v2145_v17 = vpop.permute.xlu1 %579 }
  0xc9   :  { %v2151_v37 = vpop.permute.xlu1 %564 }
  0xca   :  { %3558 = vst [vmem:[#allocation17_spill] sm:$0xff] %v2151_v37 }
  0xf5   :  { %v234_v42 = vpop.xlane.xlu2 %233 }
  0xf6   :  { %v251_v38 = vmul.f32 %v234_v42, %v1961_v23  ;;  %v226_v16 = vpop.xlane.xlu1 %225 }
  0xf7   :  { %v249_v39 = vmul.f32 %v226_v16, %v1961_v23 }
  0xf8   :  { %v279_v20 = vadd.f32 1e-05, %v251_v38 }
  0xf9   :  { %v2157_v21 = vadd.f32 1e-05, %v249_v39 }
  0xfa   :  { %1683 = vrsqrt.f32 %v279_v20  ;;  %vm407_vm3 = vweird.f32 %v279_v20 }
  0xfb   :  { %1685 = vrsqrt.f32 %v2157_v21  ;;  %vm387_vm4 = vweird.f32 %v2157_v21 }
  0xfd   :  { %v238_v22 = vpop.xlane.xlu0 %237 }
  0xfe   :  { %v230_v24 = vpop.xlane.xlu2 %229  ;;  %v252_v31 = vmul.f32 %v238_v22, %v1961_v23 }
  0xff   :  { %v222_v29 = vpop.xlane.xlu1 %221  ;;  %v250_v33 = vmul.f32 %v230_v24, %v1961_v23 }
 0x100   :  { %v248_v5 = vmul.f32 %v222_v29, %v1961_v23  ;;  %v2163_v28 = vpop.eup %1683  ;;  %v2165_v48 = vadd.f32 1e-05, %v252_v31 }
 0x101   :  { %v2167_v32 = vpop.eup %1685  ;;  %v402_v51 = vmul.f32 %v2163_v28, %v279_v20  ;;  %v2170_v27 = vadd.f32 1e-05, %v250_v33  ;;  %vm408_vm2 = vweird.f32 %v2163_v28 }
 0x102   :  { %v2172_v2 = vadd.f32 1e-05, %v248_v5  ;;  %1687 = vrsqrt.f32 %v2165_v48  ;;  %v382_v4 = vmul.f32 %v2167_v32, %v2157_v21  ;;  %vm2217_vm5 = vmor %vm407_vm3, %vm408_vm2  ;;  %vm388_vm6 = vweird.f32 %v2167_v32 }
 0x103   :  { %v403_v26 = vmul.f32 %v2163_v28, %v402_v51  ;;  %1689 = vrsqrt.f32 %v2170_v27  ;;  %vm417_vm7 = vweird.f32 %v2165_v48  ;;  %vm2262_vm12 = vmor %vm387_vm4, %vm388_vm6 }
 0x104   :  { %1691 = vrsqrt.f32 %v2172_v2  ;;  %v383_v22 = vmul.f32 %v2167_v32, %v382_v4  ;;  %vm377_vm8 = vweird.f32 %v2172_v2 }
 0x105   :  { %v404_v50 = vmul.f32 0.5, %v403_v26  ;;  %v218_v54 = vpop.xlane.xlu0 %217 }
 0x106   :  { %v210_v55 = vpop.xlane.xlu2 %209  ;;  %v247_v38 = vmul.f32 %v218_v54, %v1961_v23 }
 0x107   :  { %v202_v42 = vpop.xlane.xlu1 %201  ;;  %v245_v16 = vmul.f32 %v210_v55, %v1961_v23  ;;  %v405_v31 = vsub.f32 1.5, %v404_v50  ;;  %v384_v50 = vmul.f32 0.5, %v383_v22 }
 0x108   :  { %v2182_v39 = vpop.eup %1687  ;;  %v2185_v24 = vadd.f32 1e-05, %v247_v38  ;;  %v243_v51 = vmul.f32 %v202_v42, %v1961_v23 }
 0x109   :  { %v2187_v29 = vpop.eup %1689  ;;  %v412_v33 = vmul.f32 %v2182_v39, %v2165_v48  ;;  %v2191_v5 = vadd.f32 1e-05, %v245_v16  ;;  %v406_v44 = vmul.f32 %v2163_v28, %v405_v31  ;;  %v385_v20 = vsub.f32 1.5, %v384_v50 }
 0x10a   :  { %v2194_v26 = vpop.eup %1691  ;;  %1693 = vrsqrt.f32 %v2185_v24  ;;  %v392_v54 = vmul.f32 %v2187_v29, %v2170_v27  ;;  %v2205_v42 = vadd.f32 1e-05, %v243_v51  ;;  %vm418_vm10 = vweird.f32 %v2182_v39 }
 0x10b   :  { %v372_v4 = vmul.f32 %v2194_v26, %v2172_v2  ;;  %1695 = vrsqrt.f32 %v2191_v5  ;;  %v413_v55 = vmul.f32 %v2182_v39, %v412_v33  ;;  %vm378_vm9 = vweird.f32 %v2194_v26  ;;  %vm419_vm3 = vmor %vm417_vm7, %vm418_vm10 }
 0x10c   :  { %v393_v22 = vmul.f32 %v2187_v29, %v392_v54  ;;  %1697 = vrsqrt.f32 %v2205_v42  ;;  %vm398_vm11 = vweird.f32 %v2187_v29  ;;  %vm347_vm13 = vweird.f32 %v2191_v5  ;;  %vm2276_vm15 = vmor %vm377_vm8, %vm378_vm9 }
 0x10d   :  { %v373_v38 = vmul.f32 %v2194_v26, %v372_v4  ;;  %v214_v16 = vpop.xlane.xlu0 %213  ;;  %v414_v51 = vmul.f32 0.5, %v413_v55  ;;  %vm367_vm14 = vweird.f32 %v2185_v24 }
 0x10e   :  { %v206_v0 = vpop.xlane.xlu2 %205  ;;  %v246_v49 = vmul.f32 %v214_v16, %v1961_v23  ;;  %v2242_v37 = vmul.f32 0.5, %v393_v22 }
 0x10f   :  { %v198_v25 = vpop.xlane.xlu1 %197  ;;  %v374_v40 = vmul.f32 0.5, %v373_v38  ;;  %v244_v33 = vmul.f32 %v206_v0, %v1961_v23  ;;  %v410_v38 = vsel %vm2217_vm5, %v2163_v28, %v406_v44  ;;  %v415_v44 = vsub.f32 1.5, %v414_v51 }
 0x110   :  { %v242_v11 = vmul.f32 %v198_v25, %v1961_v23  ;;  %v2213_v4 = vpop.eup %1693  ;;  %v2222_v16 = vadd.f32 1e-05, %v246_v49  ;;  %v265_v49 = vld [vmem:[%s3522_s2 + $0x60] sm:$0xff]  ;;  %vm397_vm5 = vweird.f32 %v2170_v27  ;;  %v264_v27 = vld [vmem:[%s3522_s2 + $0x58] sm:$0xff] }
 0x111   :  { %v2224_v54 = vpop.eup %1695  ;;  %v362_v0 = vmul.f32 %v2213_v4, %v2185_v24  ;;  %v2229_v25 = vadd.f32 1e-05, %v244_v33  ;;  %v375_v18 = vsub.f32 1.5, %v374_v40  ;;  %v433_v28 = vmul.f32 %v410_v38, %v265_v49  ;;  %vm2368_vm7 = vmor %vm397_vm5, %vm398_vm11 }
 0x112   :  { %v342_v50 = vmul.f32 %v2224_v54, %v2191_v5  ;;  %v2236_v55 = vadd.f32 1e-05, %v242_v11  ;;  %1699 = vrsqrt.f32 %v2222_v16  ;;  %v386_v11 = vmul.f32 %v2167_v32, %v385_v20  ;;  %v2256_v19 = vpop.eup %1697  ;;  %v266_v20 = vld [vmem:[%s3522_s2 + $0x68] sm:$0xff] }
 0x113   :  { %v363_v33 = vmul.f32 %v2213_v4, %v362_v0  ;;  %1701 = vrsqrt.f32 %v2229_v25  ;;  %v395_v38 = vsub.f32 1.5, %v2242_v37  ;;  %497 = vperm.xlu1 %1680, %v433_v28   ;;  %vm368_vm1 = vweird.f32 %v2213_v4 }
 0x114   :  { %v343_v40 = vmul.f32 %v2224_v54, %v342_v50  ;;  %1703 = vrsqrt.f32 %v2236_v55  ;;  %v376_v50 = vmul.f32 %v2194_v26, %v375_v18  ;;  %vm348_vm2 = vweird.f32 %v2224_v54  ;;  %vm2342_vm6 = vmor %vm367_vm14, %vm368_vm1 }
 0x115   :  { %v194_v22 = vpop.xlane.xlu0 %193  ;;  %v364_v0 = vmul.f32 0.5, %v363_v33  ;;  %v390_v33 = vsel %vm2262_vm12, %v2167_v32, %v386_v11  ;;  %vm2329_vm4 = vmor %vm347_vm13, %vm348_vm2  ;;  %vm357_vm8 = vweird.f32 %v2222_v16  ;;  %vm317_vm12 = vweird.f32 %v2236_v55 }
 0x116   :  { %v344_v31 = vmul.f32 0.5, %v343_v40  ;;  %v186_v14 = vpop.xlane.xlu2 %185  ;;  %v241_v51 = vmul.f32 %v194_v22, %v1961_v23  ;;  %v380_v32 = vsel %vm2276_vm15, %v2194_v26, %v376_v50  ;;  %v322_v26 = vmul.f32 %v2256_v19, %v2205_v42 }
 0x117   :  { %v239_v49 = vmul.f32 %v186_v14, %v1961_v23  ;;  %v416_v14 = vmul.f32 %v2182_v39, %v415_v44  ;;  %v365_v11 = vsub.f32 1.5, %v364_v0  ;;  %v431_v21 = vmul.f32 %v390_v33, %v263_v15 }
 0x118   :  { %v2270_v18 = vpop.eup %1699  ;;  %v2281_v37 = vadd.f32 1e-05, %v241_v51  ;;  %v345_v28 = vsub.f32 1.5, %v344_v31  ;;  %v262_v51 = vld [vmem:[%s3522_s2 + $0x48] sm:$0xff]  ;;  %vm337_vm14 = vweird.f32 %v2229_v25  ;;  %vm328_vm5 = vweird.f32 %v2256_v19 }
 0x119   :  { %v2287_v40 = vpop.eup %1701  ;;  %v352_v2 = vmul.f32 %v2270_v18, %v2222_v16  ;;  %v2291_v22 = vadd.f32 1e-05, %v239_v49  ;;  %v430_v13 = vmul.f32 %v380_v32, %v262_v51  ;;  %v420_v30 = vsel %vm419_vm3, %v2182_v39, %v416_v14  ;;  %v256_v16 = vld [vmem:[%s3522_s2 + $0x18] sm:$0xff] }
 0x11a   :  { %v2302_v44 = vpop.eup %1703  ;;  %v332_v31 = vmul.f32 %v2287_v40, %v2229_v25  ;;  %1705 = vrsqrt.f32 %v2281_v37  ;;  %v434_v47 = vmul.f32 %v420_v30, %v266_v20  ;;  %v346_v6 = vmul.f32 %v2224_v54, %v345_v28 }
 0x11b   :  { %v312_v0 = vmul.f32 %v2302_v44, %v2236_v55  ;;  %v353_v50 = vmul.f32 %v2270_v18, %v352_v2  ;;  %1707 = vrsqrt.f32 %v2291_v22  ;;  %482 = vperm.xlu0 %1678, %v430_v13   ;;  %v396_v39 = vmul.f32 %v2187_v29, %v395_v38  ;;  %487 = vperm.xlu1 %1680, %v431_v21  }
 0x11c   :  { %v333_v49 = vmul.f32 %v2287_v40, %v332_v31  ;;  %v366_v33 = vmul.f32 %v2213_v4, %v365_v11  ;;  %v323_v30 = vmul.f32 %v2256_v19, %v322_v26  ;;  %502 = vperm.xlu2 %1679, %v434_v47   ;;  %vm358_vm9 = vweird.f32 %v2270_v18 }
 0x11d   :  { %v313_v12 = vmul.f32 %v2302_v44, %v312_v0  ;;  %v354_v48 = vmul.f32 0.5, %v353_v50  ;;  %v190_v46 = vpop.xlane.xlu0 %189  ;;  %v400_v20 = vsel %vm2368_vm7, %v2187_v29, %v396_v39  ;;  %vm318_vm10 = vweird.f32 %v2302_v44  ;;  %vm2397_vm13 = vmor %vm357_vm8, %vm358_vm9  ;;  %v534_v29 = vld [vmem:[%s3521_s3 + $0x8] sm:$0xff] }
 0x11e   :  { %v334_v31 = vmul.f32 0.5, %v333_v49  ;;  %v240_v15 = vmul.f32 %v190_v46, %v1961_v23  ;;  %v259_v23 = vld [vmem:[%s3522_s2 + $0x30] sm:$0xff]  ;;  %v350_v46 = vsel %vm2329_vm4, %v2224_v54, %v346_v6  ;;  %v370_v47 = vsel %vm2342_vm6, %v2213_v4, %v366_v33  ;;  %vm2402_vm15 = vmor %vm317_vm12, %vm318_vm10 }
 0x11f   :  { %v314_v14 = vmul.f32 0.5, %v313_v12  ;;  %v355_v28 = vsub.f32 1.5, %v354_v48  ;;  %v261_v12 = vld [vmem:[%s3522_s2 + $0x40] sm:$0xff]  ;;  %v427_v11 = vmul.f32 %v350_v46, %v259_v23  ;;  %vm338_vm11 = vweird.f32 %v2287_v40  ;;  %v258_v23 = vld [vmem:[%s3522_s2 + $0x28] sm:$0xff] }
 0x120   :  { %v2352_v13 = vpop.eup %1705  ;;  %v335_v38 = vsub.f32 1.5, %v334_v31  ;;  %v2354_v24 = vadd.f32 1e-05, %v240_v15  ;;  %v429_v0 = vmul.f32 %v370_v47, %v261_v12  ;;  %v432_v31 = vmul.f32 %v400_v20, %v264_v27  ;;  %vm2406_vm1 = vmor %vm337_vm14, %vm338_vm11  ;;  %v253_v27 = vld [vmem:[%s3522_s2] sm:$0xff] }
 0x121   :  { %v2362_v51 = vpop.eup %1707  ;;  %v315_v54 = vsub.f32 1.5, %v314_v14  ;;  %v302_v32 = vmul.f32 %v2352_v13, %v2281_v37  ;;  %v356_v48 = vmul.f32 %v2270_v18, %v355_v28  ;;  %v324_v15 = vmul.f32 0.5, %v323_v30 }
 0x122   :  { %v282_v4 = vmul.f32 %v2362_v51, %v2291_v22  ;;  %1709 = vrsqrt.f32 %v2354_v24  ;;  %v336_v21 = vmul.f32 %v2287_v40, %v335_v38  ;;  %v260_v38 = vld [vmem:[%s3522_s2 + $0x38] sm:$0xff]  ;;  %vm288_vm2 = vweird.f32 %v2362_v51 }
 0x123   :  { %v303_v26 = vmul.f32 %v2352_v13, %v302_v32  ;;  %v316_v50 = vmul.f32 %v2302_v44, %v315_v54  ;;  %467 = vperm.xlu0 %1678, %v427_v11   ;;  %477 = vperm.xlu1 %1680, %v429_v0   ;;  %v360_v28 = vsel %vm2397_vm13, %v2270_v18, %v356_v48  ;;  %v325_v12 = vsub.f32 1.5, %v324_v15 }
 0x124   :  { %v283_v49 = vmul.f32 %v2362_v51, %v282_v4  ;;  %492 = vperm.xlu2 %1679, %v432_v31   ;;  %v340_v46 = vsel %vm2406_vm1, %v2287_v40, %v336_v21  ;;  %v428_v32 = vmul.f32 %v360_v28, %v260_v38  ;;  %vm308_vm3 = vweird.f32 %v2352_v13 }
 0x125   :  { %v304_v2 = vmul.f32 0.5, %v303_v26  ;;  %v320_v25 = vsel %vm2402_vm15, %v2302_v44, %v316_v50  ;;  %v426_v54 = vmul.f32 %v340_v46, %v258_v23  ;;  %vm287_vm4 = vweird.f32 %v2291_v22  ;;  %v255_v26 = vld [vmem:[%s3522_s2 + $0x10] sm:$0xff]  ;;  %v257_v50 = vld [vmem:[%s3522_s2 + $0x20] sm:$0xff] }
 0x126   :  { %v284_v33 = vmul.f32 0.5, %v283_v49  ;;  %v424_v47 = vmul.f32 %v320_v25, %v256_v16  ;;  %vm289_vm6 = vmor %vm287_vm4, %vm288_vm2  ;;  %vm307_vm7 = vweird.f32 %v2281_v37  ;;  %v326_v18 = vmul.f32 %v2256_v19, %v325_v12 }
 0x127   :  { %v305_v14 = vsub.f32 1.5, %v304_v2  ;;  %vm309_vm8 = vmor %vm307_vm7, %vm308_vm3  ;;  %vm327_vm9 = vweird.f32 %v2205_v42  ;;  %vm297_vm12 = vweird.f32 %v2354_v24  ;;  %v254_v42 = vld [vmem:[%s3522_s2 + $0x8] sm:$0xff]  ;;  %v533_v2 = vld [vmem:[%s3521_s3] sm:$0xff]  ;;  %vm841_vm14 = vcmask 916480  }
 0x128   :  { %v1710_v30 = vpop.eup %1709  ;;  %v285_v5 = vsub.f32 1.5, %v284_v33  ;;  %vm329_vm10 = vmor %vm327_vm9, %vm328_vm5 }
 0x129   :  { %v292_v44 = vmul.f32 %v1710_v30, %v2354_v24  ;;  %v306_v40 = vmul.f32 %v2352_v13, %v305_v14  ;;  %v330_v49 = vsel %vm329_vm10, %v2256_v19, %v326_v18  ;;  %vm298_vm11 = vweird.f32 %v1710_v30 }
 0x12a   :  { %v286_v4 = vmul.f32 %v2362_v51, %v285_v5  ;;  %v425_v48 = vmul.f32 %v330_v49, %v257_v50  ;;  %vm299_vm13 = vmor %vm297_vm12, %vm298_vm11  ;;  %v671_v5 = vld [vmem:[%s3523_s1 + $0xd0] sm:$0xff] }
 0x12b   :  { %v293_v6 = vmul.f32 %v1710_v30, %v292_v44  ;;  %452 = vperm.xlu0 %1678, %v424_v47   ;;  %462 = vperm.xlu1 %1680, %v426_v54   ;;  %v310_v37 = vsel %vm309_vm8, %v2352_v13, %v306_v40 }
 0x12c   :  { %472 = vperm.xlu2 %1679, %v428_v32   ;;  %v290_v20 = vsel %vm289_vm6, %v2362_v51, %v286_v4  ;;  %v423_v21 = vmul.f32 %v310_v37, %v255_v26 }
 0x12d   :  { %v294_v11 = vmul.f32 0.5, %v293_v6  ;;  %v421_v0 = vmul.f32 %v290_v20, %v253_v27 }
 0x12f   :  { %v295_v22 = vsub.f32 1.5, %v294_v11 }
 0x131   :  { %v296_v51 = vmul.f32 %v1710_v30, %v295_v22 }
 0x133   :  { %437 = vperm.xlu0 %1678, %v421_v0   ;;  %447 = vperm.xlu1 %1680, %v423_v21   ;;  %v300_v13 = vsel %vm299_vm13, %v1710_v30, %v296_v51 }
 0x134   :  { %457 = vperm.xlu2 %1679, %v425_v48   ;;  %v422_v19 = vmul.f32 %v300_v13, %v254_v42 }
 0x13b   :  { %554 = vperm.xlu0 %1678, %v534_v29   ;;  %549 = vperm.xlu1 %1680, %v533_v2   ;;  %v663_v2 = vld [vmem:[%s3523_s1 + $0x90] sm:$0xff] }
 0x13c   :  { %442 = vperm.xlu2 %1679, %v422_v19  }
 0x176   :  { %v503_v24 = vpop.permute.xlu2 %502 }
 0x177   :  { %v531_v31 = vmul.f32 %v503_v24, %v1992_v60  ;;  %v532_v15 = vmul.f32 %v503_v24, %v1995_v61  ;;  %v669_v60 = vld [vmem:[%s3523_s1 + $0xc0] sm:$0xff]  ;;  %v670_v61 = vld [vmem:[%s3523_s1 + $0xc8] sm:$0xff] }
 0x178   :  { %v3578_v24 = vld [vmem:[#allocation15_spill] sm:$0xff] }
 0x179   :  { %v643_v55 = vadd.f32 %v2131_v56, %v531_v31  ;;  %v644_v16 = vadd.f32 %v2131_v56, %v532_v15  ;;  %v672_v56 = vld [vmem:[%s3523_s1 + $0xd8] sm:$0xff]  ;;  %v3579_v15 = vld [vmem:[#allocation2_spill] sm:$0xff] }
 0x17b   :  { %v699_v38 = vadd.f32 %v671_v5, %v643_v55  ;;  %v700_v44 = vadd.f32 %v672_v56, %v644_v16 }
 0x17e   :  { %v493_v39 = vpop.permute.xlu2 %492 }
 0x17f   :  { %v527_v14 = vmul.f32 %v493_v39, %v1998_v62  ;;  %v528_v23 = vmul.f32 %v493_v39, %v2001_v63  ;;  %v667_v62 = vld [vmem:[%s3523_s1 + $0xb0] sm:$0xff]  ;;  %v668_v63 = vld [vmem:[%s3523_s1 + $0xb8] sm:$0xff] }
 0x181   :  { %v639_v32 = vadd.f32 %v2133_v57, %v527_v14  ;;  %v640_v4 = vadd.f32 %v2133_v57, %v528_v23  ;;  %v665_v57 = vld [vmem:[%s3523_s1 + $0xa0] sm:$0xff] }
 0x183   :  { %v695_v27 = vadd.f32 %v667_v62, %v639_v32  ;;  %v696_v20 = vadd.f32 %v668_v63, %v640_v4  ;;  %v3583_v32 = vld [vmem:[#allocation5_spill] sm:$0xff]  ;;  %v655_v63 = vld [vmem:[%s3523_s1 + $0x50] sm:$0xff] }
 0x185   :  { %v498_v33 = vpop.permute.xlu1 %497 }
 0x186   :  { %v529_v25 = vmul.f32 %v498_v33, %v1966_v35  ;;  %v530_v30 = vmul.f32 %v498_v33, %v1969_v36  ;;  %v473_v12 = vpop.permute.xlu2 %472  ;;  %v3580_v33 = vld [vmem:[#allocation3_spill] sm:$0xff] }
 0x187   :  { %v519_v51 = vmul.f32 %v473_v12, %v2063_v52  ;;  %v520_v52 = vmul.f32 %v473_v12, %v2050_v1 }
 0x188   :  { %v641_v35 = vadd.f32 %v2141_v10, %v529_v25  ;;  %v642_v36 = vadd.f32 %v2141_v10, %v530_v30  ;;  %v657_v25 = vld [vmem:[%s3523_s1 + $0x60] sm:$0xff] }
 0x189   :  { %v631_v31 = vadd.f32 %v3578_v24, %v519_v51  ;;  %v632_v56 = vadd.f32 %v3578_v24, %v520_v52  ;;  %v3589_v52 = vld [vmem:[#allocation8_spill] sm:$0xff] }
 0x18a   :  { %v697_v46 = vadd.f32 %v669_v60, %v641_v35  ;;  %v698_v28 = vadd.f32 %v670_v61, %v642_v36  ;;  %v659_v35 = vld [vmem:[%s3523_s1 + $0x70] sm:$0xff] }
 0x18b   :  { %v3590_v24 = vld [vmem:[#allocation16_spill] sm:$0xff] }
 0x18c   :  { %v839_v6 = vpack.c.bf16 %v699_v38, %v697_v46  ;;  %v840_v54 = vpack.c.bf16 %v700_v44, %v698_v28  ;;  %v660_v46 = vld [vmem:[%s3523_s1 + $0x78] sm:$0xff]  ;;  %v3581_v38 = vld [vmem:[#allocation18_spill] sm:$0xff] }
 0x18d   :  { %v483_v47 = vpop.permute.xlu0 %482  ;;  %v488_v40 = vpop.permute.xlu1 %487  ;;  %v688_v62 = vadd.f32 %v660_v46, %v632_v56  ;;  %v3594_v56 = vld [vmem:[#allocation11_spill] sm:$0xff] }
 0x18e   :  { %v525_v11 = vmul.f32 %v488_v40, %v1972_v41  ;;  %v526_v10 = vmul.f32 %v488_v40, %v1975_v43  ;;  %969 = vmatpush.bf16.msra.mxu0 %v839_v6  ;;  %1662 = vmatpush.bf16.msra.mxu2 %v839_v6  ;;  %v666_v41 = vld [vmem:[%s3523_s1 + $0xa8] sm:$0xff]  ;;  %v523_v22 = vmul.f32 %v483_v47, %v2004_v3  ;;  %v3582_v6 = vld [vmem:[#allocation4_spill] sm:$0xff] }
 0x18f   :  { %1188 = vmatpush.bf16.msra.mxu1 %v840_v54  ;;  %1669 = vmatpush.bf16.msra.mxu3 %v840_v54  ;;  %v524_v26 = vmul.f32 %v483_v47, %v2007_v7  ;;  %v687_v40 = vadd.f32 %v659_v35, %v631_v31 }
 0x190   :  { %v637_v43 = vadd.f32 %v2135_v53, %v525_v11  ;;  %v638_v18 = vadd.f32 %v2135_v53, %v526_v10  ;;  %v458_v53 = vpop.permute.xlu2 %457  ;;  %v635_v29 = vadd.f32 %v2139_v59, %v523_v22  ;;  %v653_v11 = vld [vmem:[%s3523_s1 + $0x40] sm:$0xff]  ;;  %v654_v10 = vld [vmem:[%s3523_s1 + $0x48] sm:$0xff] }
 0x191   :  { %v636_v19 = vadd.f32 %v2139_v59, %v524_v26  ;;  %v513_v39 = vmul.f32 %v458_v53, %v3579_v15  ;;  %v514_v55 = vmul.f32 %v458_v53, %v3580_v33  ;;  %v3587_v53 = vld [vmem:[#allocation17_spill] sm:$0xff] }
 0x192   :  { %v693_v37 = vadd.f32 %v665_v57, %v637_v43  ;;  %v694_v0 = vadd.f32 %v666_v41, %v638_v18  ;;  %v691_v5 = vadd.f32 %v663_v2, %v635_v29  ;;  %v656_v57 = vld [vmem:[%s3523_s1 + $0x58] sm:$0xff]  ;;  %v3584_v41 = vld [vmem:[#allocation14_spill] sm:$0xff] }
 0x193   :  { %v625_v28 = vadd.f32 %v3581_v38, %v513_v39  ;;  %v626_v44 = vadd.f32 %v3581_v38, %v514_v55  ;;  %v645_v38 = vld [vmem:[%s3523_s1] sm:$0xff] }
 0x194   :  { %v837_v49 = vpack.c.bf16 %v695_v27, %v693_v37  ;;  %v838_v21 = vpack.c.bf16 %v696_v20, %v694_v0  ;;  %v3585_v20 = vld [vmem:[#allocation6_spill] sm:$0xff] }
 0x195   :  { %v468_v50 = vpop.permute.xlu0 %467  ;;  %v478_v48 = vpop.permute.xlu1 %477  ;;  %v681_v37 = vadd.f32 %v653_v11, %v625_v28  ;;  %v682_v0 = vadd.f32 %v654_v10, %v626_v44  ;;  %v646_v28 = vld [vmem:[%s3523_s1 + $0x8] sm:$0xff] }
 0x196   :  { %v517_v42 = vmul.f32 %v468_v50, %v2036_v34  ;;  %v518_v13 = vmul.f32 %v468_v50, %v2039_v45  ;;  %v521_v3 = vmul.f32 %v478_v48, %v2026_v9  ;;  %v522_v7 = vmul.f32 %v478_v48, %v2010_v8  ;;  %970 = vmatpush.bf16.msra.mxu0 %v837_v49  ;;  %v661_v34 = vld [vmem:[%s3523_s1 + $0x80] sm:$0xff]  ;;  %v662_v45 = vld [vmem:[%s3523_s1 + $0x88] sm:$0xff]  ;;  %v664_v8 = vld [vmem:[%s3523_s1 + $0x98] sm:$0xff] }
 0x197   :  { %1663 = vmatpush.bf16.msra.mxu2 %v837_v49  ;;  %1189 = vmatpush.bf16.msra.mxu1 %v838_v21  ;;  %v692_v61 = vadd.f32 %v664_v8, %v636_v19  ;;  %v3586_v50 = vld [vmem:[#allocation7_spill] sm:$0xff]  ;;  %v649_v8 = vld [vmem:[%s3523_s1 + $0x20] sm:$0xff] }
 0x198   :  { %v633_v9 = vadd.f32 %v2137_v58, %v521_v3  ;;  %v634_v59 = vadd.f32 %v2137_v58, %v522_v7  ;;  %v629_v1 = vadd.f32 %v2145_v17, %v517_v42  ;;  %1670 = vmatpush.bf16.msra.mxu3 %v838_v21  ;;  %v630_v16 = vadd.f32 %v2145_v17, %v518_v13  ;;  %v658_v58 = vld [vmem:[%s3523_s1 + $0x68] sm:$0xff]  ;;  %v3588_v7 = vld [vmem:[#allocation9_spill] sm:$0xff] }
 0x19a   :  { %v689_v30 = vadd.f32 %v661_v34, %v633_v9  ;;  %v690_v60 = vadd.f32 %v662_v45, %v634_v59  ;;  %v685_v23 = vadd.f32 %v657_v25, %v629_v1  ;;  %v686_v47 = vadd.f32 %v658_v58, %v630_v16  ;;  %v651_v45 = vld [vmem:[%s3523_s1 + $0x30] sm:$0xff]  ;;  %v650_v9 = vld [vmem:[%s3523_s1 + $0x28] sm:$0xff]  ;;  %v652_v59 = vld [vmem:[%s3523_s1 + $0x38] sm:$0xff]  ;;  %v443_v1 = vpop.permute.xlu2 %442 }
 0x19b   :  { %v3591_v25 = vld [vmem:[#allocation13_spill] sm:$0xff] }
 0x19c   :  { %v835_v17 = vpack.c.bf16 %v691_v5, %v689_v30  ;;  %v836_v14 = vpack.c.bf16 %v692_v61, %v690_v60  ;;  %v833_v27 = vpack.c.bf16 %v687_v40, %v685_v23  ;;  %v834_v26 = vpack.c.bf16 %v688_v62, %v686_v47  ;;  %v3592_v5 = vld [vmem:[#allocation12_spill] sm:$0xff]  ;;  %v3593_v61 = vld [vmem:[#allocation10_spill] sm:$0xff]  ;;  %v702_v62 = vld [vmem:[%s3524_s4 + $0x8] sm:$0xff] }
 0x19d   :  { %v453_v36 = vpop.permute.xlu0 %452  ;;  %v463_v12 = vpop.permute.xlu1 %462  ;;  %v507_v30 = vmul.f32 %v443_v1, %v3591_v25  ;;  %v508_v60 = vmul.f32 %v443_v1, %v3592_v5  ;;  %v701_v40 = vld [vmem:[%s3524_s4] sm:$0xff]  ;;  %v711_v1 = vld [vmem:[%s3524_s4 + $0x50] sm:$0xff] }
 0x19e   :  { %v515_v54 = vmul.f32 %v463_v12, %v3582_v6  ;;  %v516_v4 = vmul.f32 %v463_v12, %v3583_v32  ;;  %971 = vmatpush.bf16.msra.mxu0 %v835_v17  ;;  %1664 = vmatpush.bf16.msra.mxu2 %v835_v17  ;;  %v511_v22 = vmul.f32 %v453_v36, %v3585_v20  ;;  %v648_v17 = vld [vmem:[%s3523_s1 + $0x18] sm:$0xff]  ;;  %v703_v20 = vld [vmem:[%s3524_s4 + $0x10] sm:$0xff] }
 0x19f   :  { %1190 = vmatpush.bf16.msra.mxu1 %v836_v14  ;;  %1671 = vmatpush.bf16.msra.mxu3 %v836_v14  ;;  %v512_v49 = vmul.f32 %v453_v36, %v3586_v50  ;;  %v647_v36 = vld [vmem:[%s3523_s1 + $0x10] sm:$0xff] }
 0x1a0   :  { %v627_v43 = vadd.f32 %v3584_v41, %v515_v54  ;;  %v628_v18 = vadd.f32 %v3584_v41, %v516_v4  ;;  %v623_v29 = vadd.f32 %v3587_v53, %v511_v22  ;;  %v704_v22 = vld [vmem:[%s3524_s4 + $0x18] sm:$0xff]  ;;  %v755_v25 = vld [vmem:[%s3524_s4 + $0x1b0] sm:$0xff] }
 0x1a1   :  { %v624_v3 = vadd.f32 %v3587_v53, %v512_v49  ;;  %v705_v49 = vld [vmem:[%s3524_s4 + $0x20] sm:$0xff]  ;;  %v707_v53 = vld [vmem:[%s3524_s4 + $0x30] sm:$0xff] }
 0x1a2   :  { %972 = vmatpush.bf16.msra.mxu0 %v833_v27  ;;  %1665 = vmatpush.bf16.msra.mxu2 %v833_v27  ;;  %v683_v21 = vadd.f32 %v655_v63, %v627_v43  ;;  %v684_v51 = vadd.f32 %v656_v57, %v628_v18  ;;  %v679_v33 = vadd.f32 %v651_v45, %v623_v29  ;;  %v743_v63 = vld [vmem:[%s3524_s4 + $0x150] sm:$0xff]  ;;  %v744_v57 = vld [vmem:[%s3524_s4 + $0x158] sm:$0xff] }
 0x1a3   :  { %1191 = vmatpush.bf16.msra.mxu1 %v834_v26  ;;  %1672 = vmatpush.bf16.msra.mxu3 %v834_v26  ;;  %v680_v16 = vadd.f32 %v652_v59, %v624_v3  ;;  %v785_v18 = vpack.c.bf16 %v702_v62, %v701_v40  ;;  %v806_v27 = vpack.c.bf16 %v744_v57, %v743_v63  ;;  %v745_v26 = vld [vmem:[%s3524_s4 + $0x160] sm:$0xff]  ;;  %v708_v29 = vld [vmem:[%s3524_s4 + $0x38] sm:$0xff]  ;;  %v750_v3 = vld [vmem:[%s3524_s4 + $0x188] sm:$0xff] }
 0x1a4   :  { %v831_v42 = vpack.c.bf16 %v683_v21, %v681_v37  ;;  %v832_v13 = vpack.c.bf16 %v684_v51, %v682_v0  ;;  %v746_v37 = vld [vmem:[%s3524_s4 + $0x168] sm:$0xff]  ;;  %v786_v0 = vpack.c.bf16 %v704_v22, %v703_v20  ;;  %v747_v51 = vld [vmem:[%s3524_s4 + $0x170] sm:$0xff] }
 0x1a5   :  { %v438_v48 = vpop.permute.xlu0 %437  ;;  %v448_v19 = vpop.permute.xlu1 %447  ;;  %v807_v50 = vpack.c.bf16 %v746_v37, %v745_v26  ;;  %v706_v21 = vld [vmem:[%s3524_s4 + $0x28] sm:$0xff]  ;;  %v751_v45 = vld [vmem:[%s3524_s4 + $0x190] sm:$0xff] }
 0x1a6   :  { %v509_v2 = vmul.f32 %v448_v19, %v3588_v7  ;;  %v510_v34 = vmul.f32 %v448_v19, %v3589_v52  ;;  %973 = vmatpush.bf16.msra.mxu0 %v831_v42  ;;  %1666 = vmatpush.bf16.msra.mxu2 %v831_v42  ;;  %v505_v58 = vmul.f32 %v438_v48, %v3593_v61  ;;  %v749_v19 = vld [vmem:[%s3524_s4 + $0x180] sm:$0xff]  ;;  %v715_v61 = vld [vmem:[%s3524_s4 + $0x70] sm:$0xff]  ;;  %v762_v62 = vld [vmem:[%s3524_s4 + $0x1e8] sm:$0xff] }
 0x1a7   :  { %1192 = vmatpush.bf16.msra.mxu1 %v832_v13  ;;  %1673 = vmatpush.bf16.msra.mxu3 %v832_v13  ;;  %v506_v35 = vmul.f32 %v438_v48, %v3594_v56  ;;  %v748_v48 = vld [vmem:[%s3524_s4 + $0x178] sm:$0xff]  ;;  %v787_v42 = vpack.c.bf16 %v706_v21, %v705_v49  ;;  %v788_v7 = vpack.c.bf16 %v708_v29, %v707_v53  ;;  %v709_v52 = vld [vmem:[%s3524_s4 + $0x40] sm:$0xff]  ;;  %v719_v40 = vld [vmem:[%s3524_s4 + $0x90] sm:$0xff] }
 0x1a8   :  { %v621_v31 = vadd.f32 %v3590_v24, %v509_v2  ;;  %v622_v15 = vadd.f32 %v3590_v24, %v510_v34  ;;  %v808_v13 = vpack.c.bf16 %v748_v48, %v747_v51  ;;  %v809_v2 = vpack.c.bf16 %v750_v3, %v749_v19  ;;  %v710_v34 = vld [vmem:[%s3524_s4 + $0x48] sm:$0xff]  ;;  %v712_v24 = vld [vmem:[%s3524_s4 + $0x58] sm:$0xff]  ;;  %v757_v56 = vld [vmem:[%s3524_s4 + $0x1c0] sm:$0xff] }
 0x1a9   :  { %v763_v49 = vld [vmem:[%s3524_s4 + $0x1f0] sm:$0xff]  ;;  %v764_v21 = vld [vmem:[%s3524_s4 + $0x1f8] sm:$0xff] }
 0x1aa   :  { %v677_v39 = vadd.f32 %v649_v8, %v621_v31  ;;  %v678_v55 = vadd.f32 %v650_v9, %v622_v15  ;;  %v752_v8 = vld [vmem:[%s3524_s4 + $0x198] sm:$0xff]  ;;  %v789_v9 = vpack.c.bf16 %v710_v34, %v709_v52  ;;  %v753_v31 = vld [vmem:[%s3524_s4 + $0x1a0] sm:$0xff]  ;;  %v754_v15 = vld [vmem:[%s3524_s4 + $0x1a8] sm:$0xff] }
 0x1ab   :  { %v810_v59 = vpack.c.bf16 %v752_v8, %v751_v45  ;;  %v723_v52 = vld [vmem:[%s3524_s4 + $0xb0] sm:$0xff]  ;;  %v724_v34 = vld [vmem:[%s3524_s4 + $0xb8] sm:$0xff]  ;;  %v765_v45 = vld [vmem:[%s3524_s4 + $0x200] sm:$0xff] }
 0x1ac   :  { %v829_v23 = vpack.c.bf16 %v679_v33, %v677_v39  ;;  %v830_v46 = vpack.c.bf16 %v680_v16, %v678_v55  ;;  %v790_v39 = vpack.c.bf16 %v712_v24, %v711_v1  ;;  %v811_v33 = vpack.c.bf16 %v754_v15, %v753_v31  ;;  %v713_v55 = vld [vmem:[%s3524_s4 + $0x60] sm:$0xff]  ;;  %v714_v16 = vld [vmem:[%s3524_s4 + $0x68] sm:$0xff] }
 0x1ad   :  { %v555_v14 = vpop.permute.xlu0 %554  ;;  %v550_v44 = vpop.permute.xlu1 %549  ;;  %v791_v5 = vpack.c.bf16 %v714_v16, %v713_v55  ;;  %v766_v8 = vld [vmem:[%s3524_s4 + $0x208] sm:$0xff]  ;;  %v796_v1 = vpack.c.bf16 %v724_v34, %v723_v52 }
 0x1ae   :  { %v619_v12 = vadd.f32 %v555_v14, %v507_v30  ;;  %v620_v47 = vadd.f32 %v555_v14, %v508_v60  ;;  %v617_v6 = vadd.f32 %v550_v44, %v505_v58  ;;  %v618_v54 = vadd.f32 %v550_v44, %v506_v35  ;;  %974 = vmatpush.bf16.msra.mxu0 %v829_v23  ;;  %v756_v30 = vld [vmem:[%s3524_s4 + $0x1b8] sm:$0xff]  ;;  %v758_v35 = vld [vmem:[%s3524_s4 + $0x1c8] sm:$0xff]  ;;  %v717_v14 = vld [vmem:[%s3524_s4 + $0x80] sm:$0xff] }
 0x1af   :  { %1667 = vmatpush.bf16.msra.mxu2 %v829_v23  ;;  %1193 = vmatpush.bf16.msra.mxu1 %v830_v46  ;;  %v812_v60 = vpack.c.bf16 %v756_v30, %v755_v25  ;;  %v716_v58 = vld [vmem:[%s3524_s4 + $0x78] sm:$0xff]  ;;  %v718_v23 = vld [vmem:[%s3524_s4 + $0x88] sm:$0xff]  ;;  %v817_v24 = vpack.c.bf16 %v766_v8, %v765_v45  ;;  %v725_v25 = vld [vmem:[%s3524_s4 + $0xc0] sm:$0xff] }
 0x1b0   :  { %v675_v32 = vadd.f32 %v647_v36, %v619_v12  ;;  %v676_v4 = vadd.f32 %v648_v17, %v620_v47  ;;  %1674 = vmatpush.bf16.msra.mxu3 %v830_v46  ;;  %v673_v11 = vadd.f32 %v645_v38, %v617_v6  ;;  %v674_v10 = vadd.f32 %v646_v28, %v618_v54  ;;  %v759_v46 = vld [vmem:[%s3524_s4 + $0x1d0] sm:$0xff]  ;;  %v760_v38 = vld [vmem:[%s3524_s4 + $0x1d8] sm:$0xff]  ;;  %v726_v30 = vld [vmem:[%s3524_s4 + $0xc8] sm:$0xff] }
 0x1b1   :  { %v792_v36 = vpack.c.bf16 %v716_v58, %v715_v61  ;;  %v813_v17 = vpack.c.bf16 %v758_v35, %v757_v56  ;;  %v793_v28 = vpack.c.bf16 %v718_v23, %v717_v14  ;;  %v814_v44 = vpack.c.bf16 %v760_v38, %v759_v46 }
 0x1b2   :  { %v827_v41 = vpack.c.bf16 %v675_v32, %v673_v11  ;;  %v828_v43 = vpack.c.bf16 %v676_v4, %v674_v10  ;;  %v720_v11 = vld [vmem:[%s3524_s4 + $0x98] sm:$0xff]  ;;  %v761_v10 = vld [vmem:[%s3524_s4 + $0x1e0] sm:$0xff]  ;;  %v797_v56 = vpack.c.bf16 %v726_v30, %v725_v25 }
 0x1b4   :  { %975 = vmatpush.bf16.msra.mxu0 %v827_v41  ;;  %1668 = vmatpush.bf16.msra.mxu2 %v827_v41  ;;  %v794_v41 = vpack.c.bf16 %v720_v11, %v719_v40 }
 0x1b5   :  { %1194 = vmatpush.bf16.msra.mxu1 %v828_v43  ;;  %1675 = vmatpush.bf16.msra.mxu3 %v828_v43  ;;  %v815_v43 = vpack.c.bf16 %v762_v62, %v761_v10 }
 0x1b7   :  { %1578 = vmatmul.msk.bf16.vlgmr.msra.gmra.mxu0 %vm841_vm14, %v785_v18  ;;  %1599 = vmatmul.msk.bf16.vlgmr.msra.gmra.mxu2 %vm841_vm14, %v806_v27 }
 0x1b8   :  { %1620 = vmatmul.msk.bf16.vlgmr.msra.gmra.mxu1 %vm841_vm14, %v785_v18  ;;  %1641 = vmatmul.msk.bf16.vlgmr.msra.gmra.mxu3 %vm841_vm14, %v806_v27 }
 0x1c7   :  { %1579 = vmatmul.msk.bf16.gmra.mxu0 %vm841_vm14, %v786_v0  ;;  %1600 = vmatmul.msk.bf16.gmra.mxu2 %vm841_vm14, %v807_v50 }
 0x1c8   :  { %1621 = vmatmul.msk.bf16.gmra.mxu1 %vm841_vm14, %v786_v0  ;;  %1642 = vmatmul.msk.bf16.gmra.mxu3 %vm841_vm14, %v807_v50  ;;  %v721_v0 = vld [vmem:[%s3524_s4 + $0xa0] sm:$0xff]  ;;  %v722_v50 = vld [vmem:[%s3524_s4 + $0xa8] sm:$0xff] }
 0x1d7   :  { %1580 = vmatmul.msk.bf16.gmra.mxu0 %vm841_vm14, %v787_v42  ;;  %1601 = vmatmul.msk.bf16.gmra.mxu2 %vm841_vm14, %v808_v13 }
 0x1d8   :  { %1622 = vmatmul.msk.bf16.gmra.mxu1 %vm841_vm14, %v787_v42  ;;  %1643 = vmatmul.msk.bf16.gmra.mxu3 %vm841_vm14, %v808_v13  ;;  %v795_v42 = vpack.c.bf16 %v722_v50, %v721_v0  ;;  %v816_v13 = vpack.c.bf16 %v764_v21, %v763_v49 }
 0x1e7   :  { %1581 = vmatmul.msk.bf16.gmra.mxu0 %vm841_vm14, %v788_v7  ;;  %1602 = vmatmul.msk.bf16.gmra.mxu2 %vm841_vm14, %v809_v2 }
 0x1e8   :  { %1623 = vmatmul.msk.bf16.gmra.mxu1 %vm841_vm14, %v788_v7  ;;  %1644 = vmatmul.msk.bf16.gmra.mxu3 %vm841_vm14, %v809_v2 }
 0x1f7   :  { %1582 = vmatmul.msk.bf16.gmra.mxu0 %vm841_vm14, %v789_v9  ;;  %1603 = vmatmul.msk.bf16.gmra.mxu2 %vm841_vm14, %v810_v59 }
 0x1f8   :  { %1624 = vmatmul.msk.bf16.gmra.mxu1 %vm841_vm14, %v789_v9  ;;  %1645 = vmatmul.msk.bf16.gmra.mxu3 %vm841_vm14, %v810_v59 }
 0x207   :  { %1583 = vmatmul.msk.bf16.gmra.mxu0 %vm841_vm14, %v790_v39  ;;  %1604 = vmatmul.msk.bf16.gmra.mxu2 %vm841_vm14, %v811_v33 }
 0x208   :  { %1625 = vmatmul.msk.bf16.gmra.mxu1 %vm841_vm14, %v790_v39  ;;  %1646 = vmatmul.msk.bf16.gmra.mxu3 %vm841_vm14, %v811_v33 }
 0x217   :  { %1584 = vmatmul.msk.bf16.gmra.mxu0 %vm841_vm14, %v791_v5  ;;  %1605 = vmatmul.msk.bf16.gmra.mxu2 %vm841_vm14, %v812_v60 }
 0x218   :  { %1626 = vmatmul.msk.bf16.gmra.mxu1 %vm841_vm14, %v791_v5  ;;  %1647 = vmatmul.msk.bf16.gmra.mxu3 %vm841_vm14, %v812_v60  ;;  %v767_v5 = vld [vmem:[%s3524_s4 + $0x210] sm:$0xff]  ;;  %v768_v60 = vld [vmem:[%s3524_s4 + $0x218] sm:$0xff] }
 0x219   :  { %v818_v35 = vpack.c.bf16 %v768_v60, %v767_v5 }
 0x227   :  { %1585 = vmatmul.msk.bf16.gmra.mxu0 %vm841_vm14, %v792_v36  ;;  %1606 = vmatmul.msk.bf16.gmra.mxu2 %vm841_vm14, %v813_v17 }
 0x228   :  { %1627 = vmatmul.msk.bf16.gmra.mxu1 %vm841_vm14, %v792_v36  ;;  %1648 = vmatmul.msk.bf16.gmra.mxu3 %vm841_vm14, %v813_v17 }
 0x234   :  { %v977_v12 = vpop.f32.mrf.mxu0 }
 0x235   :  { %1406 = vst [vmem:[%s3525_s5] sm:$0xff] %v977_v12  ;;  %v1196_v47 = vpop.f32.mrf.mxu1  ;;  %v769_v12 = vld [vmem:[%s3524_s4 + $0x220] sm:$0xff] }
 0x236   :  { %1407 = vst.msk [vmem:[%s3525_s5 + $0x8] sm:$0xff] %vm49_vm0, %v1196_v47  ;;  %v770_v47 = vld [vmem:[%s3524_s4 + $0x228] sm:$0xff] }
 0x237   :  { %1586 = vmatmul.msk.bf16.gmra.mxu0 %vm841_vm14, %v793_v28  ;;  %1607 = vmatmul.msk.bf16.gmra.mxu2 %vm841_vm14, %v814_v44 }
 0x238   :  { %1628 = vmatmul.msk.bf16.gmra.mxu1 %vm841_vm14, %v793_v28  ;;  %1649 = vmatmul.msk.bf16.gmra.mxu3 %vm841_vm14, %v814_v44  ;;  %v727_v28 = vld [vmem:[%s3524_s4 + $0xd0] sm:$0xff]  ;;  %v728_v44 = vld [vmem:[%s3524_s4 + $0xd8] sm:$0xff] }
 0x23a   :  { %v1082_v6 = vpop.f32.mrf.mxu2 }
 0x23b   :  { %1490 = vst [vmem:[%s3525_s5 + $0x2a0] sm:$0xff] %v1082_v6  ;;  %v1301_v54 = vpop.f32.mrf.mxu3 }
 0x23c   :  { %1491 = vst.msk [vmem:[%s3525_s5 + $0x2a8] sm:$0xff] %vm49_vm0, %v1301_v54  ;;  %v979_v32 = vpop.f32.mrf.mxu0 }
 0x23d   :  { %1408 = vst [vmem:[%s3525_s5 + $0x10] sm:$0xff] %v979_v32  ;;  %v1198_v4 = vpop.f32.mrf.mxu1  ;;  %v798_v32 = vpack.c.bf16 %v728_v44, %v727_v28 }
 0x23e   :  { %1409 = vst.msk [vmem:[%s3525_s5 + $0x18] sm:$0xff] %vm49_vm0, %v1198_v4  ;;  %v819_v4 = vpack.c.bf16 %v770_v47, %v769_v12 }
 0x242   :  { %v1084_v63 = vpop.f32.mrf.mxu2 }
 0x243   :  { %1492 = vst [vmem:[%s3525_s5 + $0x2b0] sm:$0xff] %v1084_v63  ;;  %v1303_v57 = vpop.f32.mrf.mxu3 }
 0x244   :  { %1493 = vst.msk [vmem:[%s3525_s5 + $0x2b8] sm:$0xff] %vm49_vm0, %v1303_v57  ;;  %v982_v18 = vpop.f32.mrf.mxu0 }
 0x245   :  { %1410 = vst [vmem:[%s3525_s5 + $0x20] sm:$0xff] %v982_v18  ;;  %v1201_v27 = vpop.f32.mrf.mxu1  ;;  %v771_v18 = vld [vmem:[%s3524_s4 + $0x230] sm:$0xff] }
 0x246   :  { %1411 = vst.msk [vmem:[%s3525_s5 + $0x28] sm:$0xff] %vm49_vm0, %v1201_v27  ;;  %v772_v27 = vld [vmem:[%s3524_s4 + $0x238] sm:$0xff] }
 0x247   :  { %1587 = vmatmul.msk.bf16.gmra.mxu0 %vm841_vm14, %v794_v41  ;;  %1608 = vmatmul.msk.bf16.gmra.mxu2 %vm841_vm14, %v815_v43 }
 0x248   :  { %1629 = vmatmul.msk.bf16.gmra.mxu1 %vm841_vm14, %v794_v41  ;;  %1650 = vmatmul.msk.bf16.gmra.mxu3 %vm841_vm14, %v815_v43  ;;  %v729_v41 = vld [vmem:[%s3524_s4 + $0xe0] sm:$0xff]  ;;  %v730_v43 = vld [vmem:[%s3524_s4 + $0xe8] sm:$0xff] }
 0x24a   :  { %v1087_v20 = vpop.f32.mrf.mxu2 }
 0x24b   :  { %1494 = vst [vmem:[%s3525_s5 + $0x2c0] sm:$0xff] %v1087_v20  ;;  %v1306_v22 = vpop.f32.mrf.mxu3 }
 0x24c   :  { %1495 = vst.msk [vmem:[%s3525_s5 + $0x2c8] sm:$0xff] %vm49_vm0, %v1306_v22  ;;  %v984_v26 = vpop.f32.mrf.mxu0 }
 0x24d   :  { %1412 = vst [vmem:[%s3525_s5 + $0x30] sm:$0xff] %v984_v26  ;;  %v1203_v37 = vpop.f32.mrf.mxu1  ;;  %v799_v26 = vpack.c.bf16 %v730_v43, %v729_v41 }
 0x24e   :  { %1413 = vst.msk [vmem:[%s3525_s5 + $0x38] sm:$0xff] %vm49_vm0, %v1203_v37  ;;  %v820_v37 = vpack.c.bf16 %v772_v27, %v771_v18 }
 0x252   :  { %v1089_v51 = vpop.f32.mrf.mxu2 }
 0x253   :  { %1496 = vst [vmem:[%s3525_s5 + $0x2d0] sm:$0xff] %v1089_v51  ;;  %v1308_v48 = vpop.f32.mrf.mxu3 }
 0x254   :  { %1497 = vst.msk [vmem:[%s3525_s5 + $0x2d8] sm:$0xff] %vm49_vm0, %v1308_v48  ;;  %v987_v53 = vpop.f32.mrf.mxu0 }
 0x255   :  { %1414 = vst [vmem:[%s3525_s5 + $0x40] sm:$0xff] %v987_v53  ;;  %v1206_v29 = vpop.f32.mrf.mxu1  ;;  %v773_v53 = vld [vmem:[%s3524_s4 + $0x240] sm:$0xff] }
 0x256   :  { %1415 = vst.msk [vmem:[%s3525_s5 + $0x48] sm:$0xff] %vm49_vm0, %v1206_v29  ;;  %v774_v29 = vld [vmem:[%s3524_s4 + $0x248] sm:$0xff] }
 0x257   :  { %1588 = vmatmul.msk.bf16.gmra.mxu0 %vm841_vm14, %v795_v42  ;;  %1609 = vmatmul.msk.bf16.gmra.mxu2 %vm841_vm14, %v816_v13 }
 0x258   :  { %1630 = vmatmul.msk.bf16.gmra.mxu1 %vm841_vm14, %v795_v42  ;;  %1651 = vmatmul.msk.bf16.gmra.mxu3 %vm841_vm14, %v816_v13  ;;  %v731_v42 = vld [vmem:[%s3524_s4 + $0xf0] sm:$0xff]  ;;  %v732_v13 = vld [vmem:[%s3524_s4 + $0xf8] sm:$0xff] }
 0x25a   :  { %v1092_v19 = vpop.f32.mrf.mxu2 }
 0x25b   :  { %1498 = vst [vmem:[%s3525_s5 + $0x2e0] sm:$0xff] %v1092_v19  ;;  %v1311_v3 = vpop.f32.mrf.mxu3 }
 0x25c   :  { %1499 = vst.msk [vmem:[%s3525_s5 + $0x2e8] sm:$0xff] %vm49_vm0, %v1311_v3  ;;  %v989_v7 = vpop.f32.mrf.mxu0 }
 0x25d   :  { %1416 = vst [vmem:[%s3525_s5 + $0x50] sm:$0xff] %v989_v7  ;;  %v1208_v2 = vpop.f32.mrf.mxu1  ;;  %v800_v7 = vpack.c.bf16 %v732_v13, %v731_v42 }
 0x25e   :  { %1417 = vst.msk [vmem:[%s3525_s5 + $0x58] sm:$0xff] %vm49_vm0, %v1208_v2  ;;  %v821_v2 = vpack.c.bf16 %v774_v29, %v773_v53 }
 0x262   :  { %v1094_v9 = vpop.f32.mrf.mxu2 }
 0x263   :  { %1500 = vst [vmem:[%s3525_s5 + $0x2f0] sm:$0xff] %v1094_v9  ;;  %v1313_v59 = vpop.f32.mrf.mxu3 }
 0x264   :  { %1501 = vst.msk [vmem:[%s3525_s5 + $0x2f8] sm:$0xff] %vm49_vm0, %v1313_v59  ;;  %v992_v31 = vpop.f32.mrf.mxu0 }
 0x265   :  { %1418 = vst [vmem:[%s3525_s5 + $0x60] sm:$0xff] %v992_v31  ;;  %v1211_v15 = vpop.f32.mrf.mxu1  ;;  %v775_v31 = vld [vmem:[%s3524_s4 + $0x250] sm:$0xff] }
 0x266   :  { %1419 = vst.msk [vmem:[%s3525_s5 + $0x68] sm:$0xff] %vm49_vm0, %v1211_v15  ;;  %v776_v15 = vld [vmem:[%s3524_s4 + $0x258] sm:$0xff] }
 0x267   :  { %1589 = vmatmul.msk.bf16.gmra.mxu0 %vm841_vm14, %v796_v1  ;;  %1610 = vmatmul.msk.bf16.gmra.mxu2 %vm841_vm14, %v817_v24 }
 0x268   :  { %1631 = vmatmul.msk.bf16.gmra.mxu1 %vm841_vm14, %v796_v1  ;;  %1652 = vmatmul.msk.bf16.gmra.mxu3 %vm841_vm14, %v817_v24  ;;  %v733_v1 = vld [vmem:[%s3524_s4 + $0x100] sm:$0xff]  ;;  %v734_v24 = vld [vmem:[%s3524_s4 + $0x108] sm:$0xff] }
 0x26a   :  { %v1097_v39 = vpop.f32.mrf.mxu2 }
 0x26b   :  { %1502 = vst [vmem:[%s3525_s5 + $0x300] sm:$0xff] %v1097_v39  ;;  %v1316_v33 = vpop.f32.mrf.mxu3 }
 0x26c   :  { %1503 = vst.msk [vmem:[%s3525_s5 + $0x308] sm:$0xff] %vm49_vm0, %v1316_v33  ;;  %v994_v55 = vpop.f32.mrf.mxu0 }
 0x26d   :  { %1420 = vst [vmem:[%s3525_s5 + $0x70] sm:$0xff] %v994_v55  ;;  %v1213_v16 = vpop.f32.mrf.mxu1  ;;  %v801_v55 = vpack.c.bf16 %v734_v24, %v733_v1 }
 0x26e   :  { %1421 = vst.msk [vmem:[%s3525_s5 + $0x78] sm:$0xff] %vm49_vm0, %v1213_v16  ;;  %v822_v16 = vpack.c.bf16 %v776_v15, %v775_v31 }
 0x272   :  { %v1099_v61 = vpop.f32.mrf.mxu2 }
 0x273   :  { %1504 = vst [vmem:[%s3525_s5 + $0x310] sm:$0xff] %v1099_v61  ;;  %v1318_v58 = vpop.f32.mrf.mxu3 }
 0x274   :  { %1505 = vst.msk [vmem:[%s3525_s5 + $0x318] sm:$0xff] %vm49_vm0, %v1318_v58  ;;  %v997_v36 = vpop.f32.mrf.mxu0 }
 0x275   :  { %1422 = vst [vmem:[%s3525_s5 + $0x80] sm:$0xff] %v997_v36  ;;  %v1216_v17 = vpop.f32.mrf.mxu1  ;;  %v777_v36 = vld [vmem:[%s3524_s4 + $0x260] sm:$0xff] }
 0x276   :  { %1423 = vst.msk [vmem:[%s3525_s5 + $0x88] sm:$0xff] %vm49_vm0, %v1216_v17  ;;  %v778_v17 = vld [vmem:[%s3524_s4 + $0x268] sm:$0xff] }
 0x277   :  { %1590 = vmatmul.msk.bf16.gmra.mxu0 %vm841_vm14, %v797_v56  ;;  %1611 = vmatmul.msk.bf16.gmra.mxu2 %vm841_vm14, %v818_v35 }
 0x278   :  { %1632 = vmatmul.msk.bf16.gmra.mxu1 %vm841_vm14, %v797_v56  ;;  %1653 = vmatmul.msk.bf16.gmra.mxu3 %vm841_vm14, %v818_v35  ;;  %v735_v56 = vld [vmem:[%s3524_s4 + $0x110] sm:$0xff]  ;;  %v736_v35 = vld [vmem:[%s3524_s4 + $0x118] sm:$0xff] }
 0x27a   :  { %v1102_v14 = vpop.f32.mrf.mxu2 }
 0x27b   :  { %1506 = vst [vmem:[%s3525_s5 + $0x320] sm:$0xff] %v1102_v14  ;;  %v1321_v23 = vpop.f32.mrf.mxu3 }
 0x27c   :  { %1507 = vst.msk [vmem:[%s3525_s5 + $0x328] sm:$0xff] %vm49_vm0, %v1321_v23  ;;  %v999_v46 = vpop.f32.mrf.mxu0 }
 0x27d   :  { %1424 = vst [vmem:[%s3525_s5 + $0x90] sm:$0xff] %v999_v46  ;;  %v1218_v38 = vpop.f32.mrf.mxu1  ;;  %v802_v46 = vpack.c.bf16 %v736_v35, %v735_v56 }
 0x27e   :  { %1425 = vst.msk [vmem:[%s3525_s5 + $0x98] sm:$0xff] %vm49_vm0, %v1218_v38  ;;  %v823_v38 = vpack.c.bf16 %v778_v17, %v777_v36 }
 0x282   :  { %v1104_v6 = vpop.f32.mrf.mxu2 }
 0x283   :  { %1508 = vst [vmem:[%s3525_s5 + $0x330] sm:$0xff] %v1104_v6  ;;  %v1323_v54 = vpop.f32.mrf.mxu3 }
 0x284   :  { %1509 = vst.msk [vmem:[%s3525_s5 + $0x338] sm:$0xff] %vm49_vm0, %v1323_v54  ;;  %v1002_v40 = vpop.f32.mrf.mxu0 }
 0x285   :  { %1426 = vst [vmem:[%s3525_s5 + $0xa0] sm:$0xff] %v1002_v40  ;;  %v1221_v11 = vpop.f32.mrf.mxu1  ;;  %v779_v40 = vld [vmem:[%s3524_s4 + $0x270] sm:$0xff] }
 0x286   :  { %1427 = vst.msk [vmem:[%s3525_s5 + $0xa8] sm:$0xff] %vm49_vm0, %v1221_v11  ;;  %v780_v11 = vld [vmem:[%s3524_s4 + $0x278] sm:$0xff] }
 0x287   :  { %1591 = vmatmul.msk.bf16.gmra.mxu0 %vm841_vm14, %v798_v32  ;;  %1612 = vmatmul.msk.bf16.gmra.mxu2 %vm841_vm14, %v819_v4 }
 0x288   :  { %1633 = vmatmul.msk.bf16.gmra.mxu1 %vm841_vm14, %v798_v32  ;;  %1654 = vmatmul.msk.bf16.gmra.mxu3 %vm841_vm14, %v819_v4  ;;  %v737_v32 = vld [vmem:[%s3524_s4 + $0x120] sm:$0xff]  ;;  %v738_v4 = vld [vmem:[%s3524_s4 + $0x128] sm:$0xff] }
 0x28a   :  { %v1107_v10 = vpop.f32.mrf.mxu2 }
 0x28b   :  { %1510 = vst [vmem:[%s3525_s5 + $0x340] sm:$0xff] %v1107_v10  ;;  %v1326_v62 = vpop.f32.mrf.mxu3 }
 0x28c   :  { %1511 = vst.msk [vmem:[%s3525_s5 + $0x348] sm:$0xff] %vm49_vm0, %v1326_v62  ;;  %v1004_v63 = vpop.f32.mrf.mxu0 }
 0x28d   :  { %1428 = vst [vmem:[%s3525_s5 + $0xb0] sm:$0xff] %v1004_v63  ;;  %v1223_v57 = vpop.f32.mrf.mxu1  ;;  %v803_v63 = vpack.c.bf16 %v738_v4, %v737_v32 }
 0x28e   :  { %1429 = vst.msk [vmem:[%s3525_s5 + $0xb8] sm:$0xff] %vm49_vm0, %v1223_v57  ;;  %v824_v57 = vpack.c.bf16 %v780_v11, %v779_v40 }
 0x292   :  { %v1109_v20 = vpop.f32.mrf.mxu2 }
 0x293   :  { %1512 = vst [vmem:[%s3525_s5 + $0x350] sm:$0xff] %v1109_v20  ;;  %v1328_v22 = vpop.f32.mrf.mxu3 }
 0x294   :  { %1513 = vst.msk [vmem:[%s3525_s5 + $0x358] sm:$0xff] %vm49_vm0, %v1328_v22  ;;  %v1007_v0 = vpop.f32.mrf.mxu0 }
 0x295   :  { %1430 = vst [vmem:[%s3525_s5 + $0xc0] sm:$0xff] %v1007_v0  ;;  %v1226_v50 = vpop.f32.mrf.mxu1  ;;  %v781_v0 = vld [vmem:[%s3524_s4 + $0x280] sm:$0xff] }
 0x296   :  { %1431 = vst.msk [vmem:[%s3525_s5 + $0xc8] sm:$0xff] %vm49_vm0, %v1226_v50  ;;  %v782_v50 = vld [vmem:[%s3524_s4 + $0x288] sm:$0xff] }
 0x297   :  { %1592 = vmatmul.msk.bf16.gmra.mxu0 %vm841_vm14, %v799_v26  ;;  %1613 = vmatmul.msk.bf16.gmra.mxu2 %vm841_vm14, %v820_v37 }
 0x298   :  { %1634 = vmatmul.msk.bf16.gmra.mxu1 %vm841_vm14, %v799_v26  ;;  %1655 = vmatmul.msk.bf16.gmra.mxu3 %vm841_vm14, %v820_v37  ;;  %v739_v26 = vld [vmem:[%s3524_s4 + $0x130] sm:$0xff]  ;;  %v740_v37 = vld [vmem:[%s3524_s4 + $0x138] sm:$0xff] }
 0x29a   :  { %v1112_v49 = vpop.f32.mrf.mxu2 }
 0x29b   :  { %1514 = vst [vmem:[%s3525_s5 + $0x360] sm:$0xff] %v1112_v49  ;;  %v1331_v21 = vpop.f32.mrf.mxu3 }
 0x29c   :  { %1515 = vst.msk [vmem:[%s3525_s5 + $0x368] sm:$0xff] %vm49_vm0, %v1331_v21  ;;  %v1009_v51 = vpop.f32.mrf.mxu0 }
 0x29d   :  { %1432 = vst [vmem:[%s3525_s5 + $0xd0] sm:$0xff] %v1009_v51  ;;  %v1228_v48 = vpop.f32.mrf.mxu1  ;;  %v804_v51 = vpack.c.bf16 %v740_v37, %v739_v26 }
 0x29e   :  { %1433 = vst.msk [vmem:[%s3525_s5 + $0xd8] sm:$0xff] %vm49_vm0, %v1228_v48  ;;  %v825_v48 = vpack.c.bf16 %v782_v50, %v781_v0 }
 0x2a2   :  { %v1114_v19 = vpop.f32.mrf.mxu2 }
 0x2a3   :  { %1516 = vst [vmem:[%s3525_s5 + $0x370] sm:$0xff] %v1114_v19  ;;  %v1333_v3 = vpop.f32.mrf.mxu3 }
 0x2a4   :  { %1517 = vst.msk [vmem:[%s3525_s5 + $0x378] sm:$0xff] %vm49_vm0, %v1333_v3  ;;  %v1012_v52 = vpop.f32.mrf.mxu0 }
 0x2a5   :  { %1434 = vst [vmem:[%s3525_s5 + $0xe0] sm:$0xff] %v1012_v52  ;;  %v1231_v34 = vpop.f32.mrf.mxu1  ;;  %v783_v52 = vld [vmem:[%s3524_s4 + $0x290] sm:$0xff] }
 0x2a6   :  { %1435 = vst.msk [vmem:[%s3525_s5 + $0xe8] sm:$0xff] %vm49_vm0, %v1231_v34  ;;  %v784_v34 = vld [vmem:[%s3524_s4 + $0x298] sm:$0xff] }
 0x2a7   :  { %1593 = vmatmul.msk.bf16.gmra.mxu0 %vm841_vm14, %v800_v7  ;;  %1614 = vmatmul.msk.bf16.gmra.mxu2 %vm841_vm14, %v821_v2 }
 0x2a8   :  { %1635 = vmatmul.msk.bf16.gmra.mxu1 %vm841_vm14, %v800_v7  ;;  %1656 = vmatmul.msk.bf16.gmra.mxu3 %vm841_vm14, %v821_v2  ;;  %v741_v7 = vld [vmem:[%s3524_s4 + $0x140] sm:$0xff]  ;;  %v742_v2 = vld [vmem:[%s3524_s4 + $0x148] sm:$0xff] }
 0x2aa   :  { %v1117_v45 = vpop.f32.mrf.mxu2 }
 0x2ab   :  { %1518 = vst [vmem:[%s3525_s5 + $0x380] sm:$0xff] %v1117_v45  ;;  %v1336_v8 = vpop.f32.mrf.mxu3 }
 0x2ac   :  { %1519 = vst.msk [vmem:[%s3525_s5 + $0x388] sm:$0xff] %vm49_vm0, %v1336_v8  ;;  %v1014_v9 = vpop.f32.mrf.mxu0 }
 0x2ad   :  { %1436 = vst [vmem:[%s3525_s5 + $0xf0] sm:$0xff] %v1014_v9  ;;  %v1233_v59 = vpop.f32.mrf.mxu1  ;;  %v805_v9 = vpack.c.bf16 %v742_v2, %v741_v7 }
 0x2ae   :  { %1437 = vst.msk [vmem:[%s3525_s5 + $0xf8] sm:$0xff] %vm49_vm0, %v1233_v59  ;;  %v826_v59 = vpack.c.bf16 %v784_v34, %v783_v52 }
 0x2b2   :  { %v1119_v39 = vpop.f32.mrf.mxu2 }
 0x2b3   :  { %1520 = vst [vmem:[%s3525_s5 + $0x390] sm:$0xff] %v1119_v39  ;;  %v1338_v33 = vpop.f32.mrf.mxu3 }
 0x2b4   :  { %1521 = vst.msk [vmem:[%s3525_s5 + $0x398] sm:$0xff] %vm49_vm0, %v1338_v33  ;;  %v1017_v25 = vpop.f32.mrf.mxu0 }
 0x2b5   :  { %1438 = vst [vmem:[%s3525_s5 + $0x100] sm:$0xff] %v1017_v25  ;;  %v1236_v30 = vpop.f32.mrf.mxu1 }
 0x2b6   :  { %1439 = vst.msk [vmem:[%s3525_s5 + $0x108] sm:$0xff] %vm49_vm0, %v1236_v30 }
 0x2b7   :  { %1594 = vmatmul.msk.bf16.gmra.mxu0 %vm841_vm14, %v801_v55  ;;  %1615 = vmatmul.msk.bf16.gmra.mxu2 %vm841_vm14, %v822_v16 }
 0x2b8   :  { %1636 = vmatmul.msk.bf16.gmra.mxu1 %vm841_vm14, %v801_v55  ;;  %1657 = vmatmul.msk.bf16.gmra.mxu3 %vm841_vm14, %v822_v16 }
 0x2ba   :  { %v1122_v5 = vpop.f32.mrf.mxu2 }
 0x2bb   :  { %1522 = vst [vmem:[%s3525_s5 + $0x3a0] sm:$0xff] %v1122_v5  ;;  %v1341_v60 = vpop.f32.mrf.mxu3 }
 0x2bc   :  { %1523 = vst.msk [vmem:[%s3525_s5 + $0x3a8] sm:$0xff] %vm49_vm0, %v1341_v60  ;;  %v1019_v61 = vpop.f32.mrf.mxu0 }
 0x2bd   :  { %1440 = vst [vmem:[%s3525_s5 + $0x110] sm:$0xff] %v1019_v61  ;;  %v1238_v58 = vpop.f32.mrf.mxu1 }
 0x2be   :  { %1441 = vst.msk [vmem:[%s3525_s5 + $0x118] sm:$0xff] %vm49_vm0, %v1238_v58 }
 0x2c2   :  { %v1124_v14 = vpop.f32.mrf.mxu2 }
 0x2c3   :  { %1524 = vst [vmem:[%s3525_s5 + $0x3b0] sm:$0xff] %v1124_v14  ;;  %v1343_v23 = vpop.f32.mrf.mxu3 }
 0x2c4   :  { %1525 = vst.msk [vmem:[%s3525_s5 + $0x3b8] sm:$0xff] %vm49_vm0, %v1343_v23  ;;  %v1022_v28 = vpop.f32.mrf.mxu0 }
 0x2c5   :  { %1442 = vst [vmem:[%s3525_s5 + $0x120] sm:$0xff] %v1022_v28  ;;  %v1241_v44 = vpop.f32.mrf.mxu1 }
 0x2c6   :  { %1443 = vst.msk [vmem:[%s3525_s5 + $0x128] sm:$0xff] %vm49_vm0, %v1241_v44 }
 0x2c7   :  { %1595 = vmatmul.msk.bf16.gmra.mxu0 %vm841_vm14, %v802_v46  ;;  %1616 = vmatmul.msk.bf16.gmra.mxu2 %vm841_vm14, %v823_v38 }
 0x2c8   :  { %1637 = vmatmul.msk.bf16.gmra.mxu1 %vm841_vm14, %v802_v46  ;;  %1658 = vmatmul.msk.bf16.gmra.mxu3 %vm841_vm14, %v823_v38 }
 0x2ca   :  { %v1127_v12 = vpop.f32.mrf.mxu2 }
 0x2cb   :  { %1526 = vst [vmem:[%s3525_s5 + $0x3c0] sm:$0xff] %v1127_v12  ;;  %v1346_v47 = vpop.f32.mrf.mxu3 }
 0x2cc   :  { %1527 = vst.msk [vmem:[%s3525_s5 + $0x3c8] sm:$0xff] %vm49_vm0, %v1346_v47  ;;  %v1024_v6 = vpop.f32.mrf.mxu0 }
 0x2cd   :  { %1444 = vst [vmem:[%s3525_s5 + $0x130] sm:$0xff] %v1024_v6  ;;  %v1243_v54 = vpop.f32.mrf.mxu1 }
 0x2ce   :  { %1445 = vst.msk [vmem:[%s3525_s5 + $0x138] sm:$0xff] %vm49_vm0, %v1243_v54 }
 0x2d2   :  { %v1129_v10 = vpop.f32.mrf.mxu2 }
 0x2d3   :  { %1528 = vst [vmem:[%s3525_s5 + $0x3d0] sm:$0xff] %v1129_v10  ;;  %v1348_v62 = vpop.f32.mrf.mxu3 }
 0x2d4   :  { %1529 = vst.msk [vmem:[%s3525_s5 + $0x3d8] sm:$0xff] %vm49_vm0, %v1348_v62  ;;  %v1027_v41 = vpop.f32.mrf.mxu0 }
 0x2d5   :  { %1446 = vst [vmem:[%s3525_s5 + $0x140] sm:$0xff] %v1027_v41  ;;  %v1246_v43 = vpop.f32.mrf.mxu1 }
 0x2d6   :  { %1447 = vst.msk [vmem:[%s3525_s5 + $0x148] sm:$0xff] %vm49_vm0, %v1246_v43 }
 0x2d7   :  { %1596 = vmatmul.msk.bf16.gmra.mxu0 %vm841_vm14, %v803_v63  ;;  %1617 = vmatmul.msk.bf16.gmra.mxu2 %vm841_vm14, %v824_v57 }
 0x2d8   :  { %1638 = vmatmul.msk.bf16.gmra.mxu1 %vm841_vm14, %v803_v63  ;;  %1659 = vmatmul.msk.bf16.gmra.mxu3 %vm841_vm14, %v824_v57 }
 0x2da   :  { %v1132_v18 = vpop.f32.mrf.mxu2 }
 0x2db   :  { %1530 = vst [vmem:[%s3525_s5 + $0x3e0] sm:$0xff] %v1132_v18  ;;  %v1351_v27 = vpop.f32.mrf.mxu3 }
 0x2dc   :  { %1531 = vst.msk [vmem:[%s3525_s5 + $0x3e8] sm:$0xff] %vm49_vm0, %v1351_v27  ;;  %v1029_v20 = vpop.f32.mrf.mxu0 }
 0x2dd   :  { %1448 = vst [vmem:[%s3525_s5 + $0x150] sm:$0xff] %v1029_v20  ;;  %v1248_v22 = vpop.f32.mrf.mxu1 }
 0x2de   :  { %1449 = vst.msk [vmem:[%s3525_s5 + $0x158] sm:$0xff] %vm49_vm0, %v1248_v22 }
 0x2e2   :  { %v1134_v49 = vpop.f32.mrf.mxu2 }
 0x2e3   :  { %1532 = vst [vmem:[%s3525_s5 + $0x3f0] sm:$0xff] %v1134_v49  ;;  %v1353_v21 = vpop.f32.mrf.mxu3 }
 0x2e4   :  { %1533 = vst.msk [vmem:[%s3525_s5 + $0x3f8] sm:$0xff] %vm49_vm0, %v1353_v21  ;;  %v1032_v42 = vpop.f32.mrf.mxu0 }
 0x2e5   :  { %1450 = vst [vmem:[%s3525_s5 + $0x160] sm:$0xff] %v1032_v42  ;;  %v1251_v13 = vpop.f32.mrf.mxu1 }
 0x2e6   :  { %1451 = vst.msk [vmem:[%s3525_s5 + $0x168] sm:$0xff] %vm49_vm0, %v1251_v13 }
 0x2e7   :  { %1597 = vmatmul.msk.bf16.gmra.mxu0 %vm841_vm14, %v804_v51  ;;  %1618 = vmatmul.msk.bf16.gmra.mxu2 %vm841_vm14, %v825_v48 }
 0x2e8   :  { %1639 = vmatmul.msk.bf16.gmra.mxu1 %vm841_vm14, %v804_v51  ;;  %1660 = vmatmul.msk.bf16.gmra.mxu3 %vm841_vm14, %v825_v48 }
 0x2ea   :  { %v1137_v53 = vpop.f32.mrf.mxu2 }
 0x2eb   :  { %1534 = vst [vmem:[%s3525_s5 + $0x400] sm:$0xff] %v1137_v53  ;;  %v1356_v29 = vpop.f32.mrf.mxu3 }
 0x2ec   :  { %1535 = vst.msk [vmem:[%s3525_s5 + $0x408] sm:$0xff] %vm49_vm0, %v1356_v29  ;;  %v1034_v19 = vpop.f32.mrf.mxu0 }
 0x2ed   :  { %1452 = vst [vmem:[%s3525_s5 + $0x170] sm:$0xff] %v1034_v19  ;;  %v1253_v3 = vpop.f32.mrf.mxu1 }
 0x2ee   :  { %1453 = vst.msk [vmem:[%s3525_s5 + $0x178] sm:$0xff] %vm49_vm0, %v1253_v3 }
 0x2f2   :  { %v1139_v45 = vpop.f32.mrf.mxu2 }
 0x2f3   :  { %1536 = vst [vmem:[%s3525_s5 + $0x410] sm:$0xff] %v1139_v45  ;;  %v1358_v8 = vpop.f32.mrf.mxu3 }
 0x2f4   :  { %1537 = vst.msk [vmem:[%s3525_s5 + $0x418] sm:$0xff] %vm49_vm0, %v1358_v8  ;;  %v1037_v1 = vpop.f32.mrf.mxu0 }
 0x2f5   :  { %1454 = vst [vmem:[%s3525_s5 + $0x180] sm:$0xff] %v1037_v1  ;;  %v1256_v24 = vpop.f32.mrf.mxu1 }
 0x2f6   :  { %1455 = vst.msk [vmem:[%s3525_s5 + $0x188] sm:$0xff] %vm49_vm0, %v1256_v24 }
 0x2f7   :  { %1598 = vmatmul.msk.bf16.gmra.mxu0 %vm841_vm14, %v805_v9  ;;  %1619 = vmatmul.msk.bf16.gmra.mxu2 %vm841_vm14, %v826_v59 }
 0x2f8   :  { %1640 = vmatmul.msk.bf16.gmra.mxu1 %vm841_vm14, %v805_v9  ;;  %1661 = vmatmul.msk.bf16.gmra.mxu3 %vm841_vm14, %v826_v59 }
 0x2fa   :  { %v1142_v31 = vpop.f32.mrf.mxu2 }
 0x2fb   :  { %1538 = vst [vmem:[%s3525_s5 + $0x420] sm:$0xff] %v1142_v31  ;;  %v1361_v15 = vpop.f32.mrf.mxu3 }
 0x2fc   :  { %1539 = vst.msk [vmem:[%s3525_s5 + $0x428] sm:$0xff] %vm49_vm0, %v1361_v15  ;;  %v1039_v39 = vpop.f32.mrf.mxu0 }
 0x2fd   :  { %1456 = vst [vmem:[%s3525_s5 + $0x190] sm:$0xff] %v1039_v39  ;;  %v1258_v33 = vpop.f32.mrf.mxu1 }
 0x2fe   :  { %1457 = vst.msk [vmem:[%s3525_s5 + $0x198] sm:$0xff] %vm49_vm0, %v1258_v33 }
 0x302   :  { %v1144_v55 = vpop.f32.mrf.mxu2 }
 0x303   :  { %1540 = vst [vmem:[%s3525_s5 + $0x430] sm:$0xff] %v1144_v55  ;;  %v1363_v16 = vpop.f32.mrf.mxu3 }
 0x304   :  { %1541 = vst.msk [vmem:[%s3525_s5 + $0x438] sm:$0xff] %vm49_vm0, %v1363_v16  ;;  %v1042_v25 = vpop.f32.mrf.mxu0 }
 0x305   :  { %1458 = vst [vmem:[%s3525_s5 + $0x1a0] sm:$0xff] %v1042_v25  ;;  %v1261_v30 = vpop.f32.mrf.mxu1 }
 0x306   :  { %1459 = vst.msk [vmem:[%s3525_s5 + $0x1a8] sm:$0xff] %vm49_vm0, %v1261_v30 }
 0x30a   :  { %v1147_v5 = vpop.f32.mrf.mxu2 }
 0x30b   :  { %1542 = vst [vmem:[%s3525_s5 + $0x440] sm:$0xff] %v1147_v5  ;;  %v1366_v60 = vpop.f32.mrf.mxu3 }
 0x30c   :  { %1543 = vst.msk [vmem:[%s3525_s5 + $0x448] sm:$0xff] %vm49_vm0, %v1366_v60  ;;  %v1044_v61 = vpop.f32.mrf.mxu0 }
 0x30d   :  { %1460 = vst [vmem:[%s3525_s5 + $0x1b0] sm:$0xff] %v1044_v61  ;;  %v1263_v58 = vpop.f32.mrf.mxu1 }
 0x30e   :  { %1461 = vst.msk [vmem:[%s3525_s5 + $0x1b8] sm:$0xff] %vm49_vm0, %v1263_v58 }
 0x312   :  { %v1149_v56 = vpop.f32.mrf.mxu2 }
 0x313   :  { %1544 = vst [vmem:[%s3525_s5 + $0x450] sm:$0xff] %v1149_v56  ;;  %v1368_v35 = vpop.f32.mrf.mxu3 }
 0x314   :  { %1545 = vst.msk [vmem:[%s3525_s5 + $0x458] sm:$0xff] %vm49_vm0, %v1368_v35  ;;  %v1047_v36 = vpop.f32.mrf.mxu0 }
 0x315   :  { %1462 = vst [vmem:[%s3525_s5 + $0x1c0] sm:$0xff] %v1047_v36  ;;  %v1266_v17 = vpop.f32.mrf.mxu1 }
 0x316   :  { %1463 = vst.msk [vmem:[%s3525_s5 + $0x1c8] sm:$0xff] %vm49_vm0, %v1266_v17 }
 0x31a   :  { %v1152_v14 = vpop.f32.mrf.mxu2 }
 0x31b   :  { %1546 = vst [vmem:[%s3525_s5 + $0x460] sm:$0xff] %v1152_v14  ;;  %v1371_v23 = vpop.f32.mrf.mxu3 }
 0x31c   :  { %1547 = vst.msk [vmem:[%s3525_s5 + $0x468] sm:$0xff] %vm49_vm0, %v1371_v23  ;;  %v1049_v46 = vpop.f32.mrf.mxu0 }
 0x31d   :  { %1464 = vst [vmem:[%s3525_s5 + $0x1d0] sm:$0xff] %v1049_v46  ;;  %v1268_v38 = vpop.f32.mrf.mxu1 }
 0x31e   :  { %1465 = vst.msk [vmem:[%s3525_s5 + $0x1d8] sm:$0xff] %vm49_vm0, %v1268_v38 }
 0x322   :  { %v1154_v28 = vpop.f32.mrf.mxu2 }
 0x323   :  { %1548 = vst [vmem:[%s3525_s5 + $0x470] sm:$0xff] %v1154_v28  ;;  %v1373_v44 = vpop.f32.mrf.mxu3 }
 0x324   :  { %1549 = vst.msk [vmem:[%s3525_s5 + $0x478] sm:$0xff] %vm49_vm0, %v1373_v44  ;;  %v1052_v12 = vpop.f32.mrf.mxu0 }
 0x325   :  { %1466 = vst [vmem:[%s3525_s5 + $0x1e0] sm:$0xff] %v1052_v12  ;;  %v1271_v47 = vpop.f32.mrf.mxu1 }
 0x326   :  { %1467 = vst.msk [vmem:[%s3525_s5 + $0x1e8] sm:$0xff] %vm49_vm0, %v1271_v47 }
 0x32a   :  { %v1157_v6 = vpop.f32.mrf.mxu2 }
 0x32b   :  { %1550 = vst [vmem:[%s3525_s5 + $0x480] sm:$0xff] %v1157_v6  ;;  %v1376_v54 = vpop.f32.mrf.mxu3 }
 0x32c   :  { %1551 = vst.msk [vmem:[%s3525_s5 + $0x488] sm:$0xff] %vm49_vm0, %v1376_v54  ;;  %v1054_v32 = vpop.f32.mrf.mxu0 }
 0x32d   :  { %1468 = vst [vmem:[%s3525_s5 + $0x1f0] sm:$0xff] %v1054_v32  ;;  %v1273_v4 = vpop.f32.mrf.mxu1 }
 0x32e   :  { %1469 = vst.msk [vmem:[%s3525_s5 + $0x1f8] sm:$0xff] %vm49_vm0, %v1273_v4 }
 0x332   :  { %v1159_v40 = vpop.f32.mrf.mxu2 }
 0x333   :  { %1552 = vst [vmem:[%s3525_s5 + $0x490] sm:$0xff] %v1159_v40  ;;  %v1378_v11 = vpop.f32.mrf.mxu3 }
 0x334   :  { %1553 = vst.msk [vmem:[%s3525_s5 + $0x498] sm:$0xff] %vm49_vm0, %v1378_v11  ;;  %v1057_v10 = vpop.f32.mrf.mxu0 }
 0x335   :  { %1470 = vst [vmem:[%s3525_s5 + $0x200] sm:$0xff] %v1057_v10  ;;  %v1276_v62 = vpop.f32.mrf.mxu1 }
 0x336   :  { %1471 = vst.msk [vmem:[%s3525_s5 + $0x208] sm:$0xff] %vm49_vm0, %v1276_v62 }
 0x33a   :  { %v1162_v63 = vpop.f32.mrf.mxu2 }
 0x33b   :  { %1554 = vst [vmem:[%s3525_s5 + $0x4a0] sm:$0xff] %v1162_v63  ;;  %v1381_v57 = vpop.f32.mrf.mxu3 }
 0x33c   :  { %1555 = vst.msk [vmem:[%s3525_s5 + $0x4a8] sm:$0xff] %vm49_vm0, %v1381_v57  ;;  %v1059_v41 = vpop.f32.mrf.mxu0 }
 0x33d   :  { %1472 = vst [vmem:[%s3525_s5 + $0x210] sm:$0xff] %v1059_v41  ;;  %v1278_v43 = vpop.f32.mrf.mxu1 }
 0x33e   :  { %1473 = vst.msk [vmem:[%s3525_s5 + $0x218] sm:$0xff] %vm49_vm0, %v1278_v43 }
 0x342   :  { %v1164_v18 = vpop.f32.mrf.mxu2 }
 0x343   :  { %1556 = vst [vmem:[%s3525_s5 + $0x4b0] sm:$0xff] %v1164_v18  ;;  %v1383_v27 = vpop.f32.mrf.mxu3 }
 0x344   :  { %1557 = vst.msk [vmem:[%s3525_s5 + $0x4b8] sm:$0xff] %vm49_vm0, %v1383_v27  ;;  %v1062_v20 = vpop.f32.mrf.mxu0 }
 0x345   :  { %1474 = vst [vmem:[%s3525_s5 + $0x220] sm:$0xff] %v1062_v20  ;;  %v1281_v22 = vpop.f32.mrf.mxu1 }
 0x346   :  { %1475 = vst.msk [vmem:[%s3525_s5 + $0x228] sm:$0xff] %vm49_vm0, %v1281_v22 }
 0x34a   :  { %v1167_v26 = vpop.f32.mrf.mxu2 }
 0x34b   :  { %1558 = vst [vmem:[%s3525_s5 + $0x4c0] sm:$0xff] %v1167_v26  ;;  %v1386_v37 = vpop.f32.mrf.mxu3 }
 0x34c   :  { %1559 = vst.msk [vmem:[%s3525_s5 + $0x4c8] sm:$0xff] %vm49_vm0, %v1386_v37  ;;  %v1064_v0 = vpop.f32.mrf.mxu0 }
 0x34d   :  { %1476 = vst [vmem:[%s3525_s5 + $0x230] sm:$0xff] %v1064_v0  ;;  %v1283_v50 = vpop.f32.mrf.mxu1 }
 0x34e   :  { %1477 = vst.msk [vmem:[%s3525_s5 + $0x238] sm:$0xff] %vm49_vm0, %v1283_v50 }
 0x352   :  { %v1169_v49 = vpop.f32.mrf.mxu2 }
 0x353   :  { %1560 = vst [vmem:[%s3525_s5 + $0x4d0] sm:$0xff] %v1169_v49  ;;  %v1388_v21 = vpop.f32.mrf.mxu3 }
 0x354   :  { %1561 = vst.msk [vmem:[%s3525_s5 + $0x4d8] sm:$0xff] %vm49_vm0, %v1388_v21  ;;  %v1067_v51 = vpop.f32.mrf.mxu0 }
 0x355   :  { %1478 = vst [vmem:[%s3525_s5 + $0x240] sm:$0xff] %v1067_v51  ;;  %v1286_v48 = vpop.f32.mrf.mxu1 }
 0x356   :  { %1479 = vst.msk [vmem:[%s3525_s5 + $0x248] sm:$0xff] %vm49_vm0, %v1286_v48 }
 0x35a   :  { %v1172_v42 = vpop.f32.mrf.mxu2 }
 0x35b   :  { %1562 = vst [vmem:[%s3525_s5 + $0x4e0] sm:$0xff] %v1172_v42  ;;  %v1391_v13 = vpop.f32.mrf.mxu3 }
 0x35c   :  { %1563 = vst.msk [vmem:[%s3525_s5 + $0x4e8] sm:$0xff] %vm49_vm0, %v1391_v13  ;;  %v1069_v53 = vpop.f32.mrf.mxu0 }
 0x35d   :  { %1480 = vst [vmem:[%s3525_s5 + $0x250] sm:$0xff] %v1069_v53  ;;  %v1288_v29 = vpop.f32.mrf.mxu1 }
 0x35e   :  { %1481 = vst.msk [vmem:[%s3525_s5 + $0x258] sm:$0xff] %vm49_vm0, %v1288_v29 }
 0x362   :  { %v1174_v19 = vpop.f32.mrf.mxu2 }
 0x363   :  { %1564 = vst [vmem:[%s3525_s5 + $0x4f0] sm:$0xff] %v1174_v19  ;;  %v1393_v3 = vpop.f32.mrf.mxu3 }
 0x364   :  { %1565 = vst.msk [vmem:[%s3525_s5 + $0x4f8] sm:$0xff] %vm49_vm0, %v1393_v3  ;;  %v1072_v7 = vpop.f32.mrf.mxu0 }
 0x365   :  { %1482 = vst [vmem:[%s3525_s5 + $0x260] sm:$0xff] %v1072_v7  ;;  %v1291_v2 = vpop.f32.mrf.mxu1 }
 0x366   :  { %1483 = vst.msk [vmem:[%s3525_s5 + $0x268] sm:$0xff] %vm49_vm0, %v1291_v2 }
 0x36a   :  { %v1177_v52 = vpop.f32.mrf.mxu2 }
 0x36b   :  { %1566 = vst [vmem:[%s3525_s5 + $0x500] sm:$0xff] %v1177_v52  ;;  %v1396_v34 = vpop.f32.mrf.mxu3 }
 0x36c   :  { %1567 = vst.msk [vmem:[%s3525_s5 + $0x508] sm:$0xff] %vm49_vm0, %v1396_v34  ;;  %v1074_v45 = vpop.f32.mrf.mxu0 }
 0x36d   :  { %1484 = vst [vmem:[%s3525_s5 + $0x270] sm:$0xff] %v1074_v45  ;;  %v1293_v8 = vpop.f32.mrf.mxu1 }
 0x36e   :  { %1485 = vst.msk [vmem:[%s3525_s5 + $0x278] sm:$0xff] %vm49_vm0, %v1293_v8 }
 0x372   :  { %v1179_v9 = vpop.f32.mrf.mxu2 }
 0x373   :  { %1568 = vst [vmem:[%s3525_s5 + $0x510] sm:$0xff] %v1179_v9  ;;  %v1398_v59 = vpop.f32.mrf.mxu3 }
 0x374   :  { %1569 = vst.msk [vmem:[%s3525_s5 + $0x518] sm:$0xff] %vm49_vm0, %v1398_v59  ;;  %v1077_v1 = vpop.f32.mrf.mxu0 }
 0x375   :  { %1486 = vst [vmem:[%s3525_s5 + $0x280] sm:$0xff] %v1077_v1  ;;  %v1296_v24 = vpop.f32.mrf.mxu1 }
 0x376   :  { %1487 = vst.msk [vmem:[%s3525_s5 + $0x288] sm:$0xff] %vm49_vm0, %v1296_v24 }
 0x37a   :  { %v1182_v31 = vpop.f32.mrf.mxu2 }
 0x37b   :  { %1570 = vst [vmem:[%s3525_s5 + $0x520] sm:$0xff] %v1182_v31  ;;  %v1401_v15 = vpop.f32.mrf.mxu3 }
 0x37c   :  { %1571 = vst.msk [vmem:[%s3525_s5 + $0x528] sm:$0xff] %vm49_vm0, %v1401_v15  ;;  %v1079_v39 = vpop.f32.mrf.mxu0 }
 0x37d   :  { %1488 = vst [vmem:[%s3525_s5 + $0x290] sm:$0xff] %v1079_v39  ;;  %v1298_v33 = vpop.f32.mrf.mxu1 }
 0x37e   :  { %1489 = vst.msk [vmem:[%s3525_s5 + $0x298] sm:$0xff] %vm49_vm0, %v1298_v33 }
 0x382   :  { %v1184_v55 = vpop.f32.mrf.mxu2 }
 0x383   :  { %1572 = vst [vmem:[%s3525_s5 + $0x530] sm:$0xff] %v1184_v55  ;;  %v1403_v16 = vpop.f32.mrf.mxu3 }
 0x384   :  { %1573 = vst.msk [vmem:[%s3525_s5 + $0x538] sm:$0xff] %vm49_vm0, %v1403_v16 }

</bundles_post_ra>
